<compile_context>
chip_gen: v5e
topology: v5e:2x2
jax: 0.10.0
libtpu: 0.0.40
codegen_flags: <defaults>
</compile_context>

<pallas_src>
import jax
import jax.numpy as jnp
from jax import lax
from jax.experimental import pallas as pl
from jax.experimental.pallas import tpu as pltpu


def fused_simple_nn_kernel(x_ref, w0_ref, sh0_ref, w1_ref, sh1_ref,
                           p0_ref, p1_ref, wfc_ref, bfc_ref, o_ref,
                           xp0, xp1):
    """Whole batch in a single grid step; everything stays in VMEM.

    x_ref:   (B, C_in, L0)          raw NCL input (transpose folded in-kernel)
    w0_ref:  (K0, C_in, C0)         conv0 weight, BN0 scale folded in
    sh0_ref: (1, C0)                BN0 shift (+ conv0 bias)
    w1_ref:  (K1, C0, C1)           conv1 weight, BN1 scale folded in
    sh1_ref: (1, C1)                BN1 shift (+ conv1 bias)
    p0_ref:  (L0//2, L0)            AvgPool1d(2) matrix for stage 0 (const)
    p1_ref:  (L0//4, L0//2)         AvgPool1d(2) matrix for stage 1 (const)
    wfc_ref: (L1*C1, num_classes)   FC weight, flatten permutation folded in
    bfc_ref: (1, num_classes)
    o_ref:   (B, num_classes)
    xp0/xp1: VMEM scratch for 'same' zero padding (only pad rows are zeroed)
    """
    B, cin, L0 = x_ref.shape
    K0, _, c0 = w0_ref.shape
    K1, _, c1 = w1_ref.shape
    lo0, lo1 = L0 // 2, L0 // 4
    pad0, pad1 = K0 // 2, K1 // 2     # odd kernels -> symmetric 'same' padding

    # Zero only the boundary pad rows, once per call; interior rows are fully
    # overwritten for every sample below.
    xp0[pl.ds(0, pad0), :] = jnp.zeros((pad0, cin), jnp.float32)
    xp0[pl.ds(pad0 + L0, pad0), :] = jnp.zeros((pad0, cin), jnp.float32)
    xp1[pl.ds(0, pad1), :] = jnp.zeros((pad1, c0), jnp.float32)
    xp1[pl.ds(pad1 + lo0, pad1), :] = jnp.zeros((pad1, c0), jnp.float32)

    # Hoist all resident parameter loads out of the batch loop.
    w0 = w0_ref[...]
    w1 = w1_ref[...]
    sh0 = sh0_ref[...]
    sh1 = sh1_ref[...]
    p0 = p0_ref[...]
    p1 = p1_ref[...]

    feat_rows = []
    for b in range(B):                              # static unroll over batch
        # ---- stage 0: Conv1d('same') + folded BN0 + AvgPool(2) + relu6 -----
        # NCL -> channels-last folded into the kernel: one small 2D transpose.
        xp0[pl.ds(pad0, L0), :] = jnp.transpose(x_ref[b])        # (L0, cin)
        acc0 = jnp.zeros((L0, c0), jnp.float32)
        for k in range(K0):                         # static unroll over taps
            acc0 = acc0 + jnp.dot(xp0[pl.ds(k, L0), :], w0[k],
                                  preferred_element_type=jnp.float32)
        h0 = jnp.clip(
            jnp.dot(p0, acc0, preferred_element_type=jnp.float32) + sh0,
            0.0, 6.0)                               # (lo0, c0)

        # ---- stage 1: Conv1d('same') + folded BN1 + AvgPool(2) + relu ------
        xp1[pl.ds(pad1, lo0), :] = h0
        acc1 = jnp.zeros((lo0, c1), jnp.float32)
        for k in range(K1):
            acc1 = acc1 + jnp.dot(xp1[pl.ds(k, lo0), :], w1[k],
                                  preferred_element_type=jnp.float32)
        h1 = jnp.maximum(
            jnp.dot(p1, acc1, preferred_element_type=jnp.float32) + sh1,
            0.0)                                    # (lo1, c1)

        # ---- Flatten: lane-concat the lo1 rows into one dense feature row --
        # (the (l, c) vs torch (c, l) ordering is pre-folded into wfc)
        feat_rows.append(jnp.concatenate(
            [h1[l:l + 1, :] for l in range(lo1)], axis=1))       # (1, lo1*c1)

    # ---- Dropout (identity in eval) + Linear: one MXU contraction ----------
    # TODO(synk): Dropout(0.5) is identity in eval mode; training-mode RNG dropout not implemented.
    feats = jnp.concatenate(feat_rows, axis=0)      # (B, lo1*c1)
    o_ref[...] = (jnp.dot(feats, wfc_ref[...], preferred_element_type=jnp.float32)
                  + bfc_ref[...]).astype(o_ref.dtype)


def prepare_params(params, eps=1e-5):
    """One-time host-side folding (do NOT run per forward pass):
    conv (O,I,K)->(K,I,O) with eval-mode BN scale folded in, conv bias + BN
    shift folded into one per-channel shift, AvgPool(2) matrices precomputed,
    and the torch Flatten ordering folded into the FC weight (L1*C1, N)."""
    (w0, b0, g0, be0, m0, v0,
     w1, b1, g1, be1, m1, v1, wfc, bfc) = params
    s0 = g0 / jnp.sqrt(v0 + eps)
    sh0 = be0 + (b0 - m0) * s0
    s1 = g1 / jnp.sqrt(v1 + eps)
    sh1 = be1 + (b1 - m1) * s1
    w0p = jnp.transpose(w0, (2, 1, 0)) * s0[None, None, :]      # (K0, Cin, C0)
    w1p = jnp.transpose(w1, (2, 1, 0)) * s1[None, None, :]      # (K1, C0, C1)

    c1 = w1.shape[0]
    n_cls, d = wfc.shape
    l1 = d // c1
    lo0 = 2 * l1
    L0 = 4 * l1

    # Kernel flattens row-major over (l, c); torch flattens (c, l):
    # wfcp[l*c1 + c, n] = wfc[n, c*l1 + l]
    wfcp = jnp.transpose(wfc.reshape(n_cls, c1, l1), (2, 1, 0)).reshape(l1 * c1, n_cls)

    # AvgPool1d(2) matrices (applied from the left inside the kernel).
    p0 = jnp.where(jnp.arange(L0)[None, :] // 2 == jnp.arange(lo0)[:, None],
                   0.5, 0.0).astype(jnp.float32)                # (lo0, L0)
    p1 = jnp.where(jnp.arange(lo0)[None, :] // 2 == jnp.arange(l1)[:, None],
                   0.5, 0.0).astype(jnp.float32)                # (l1, lo0)

    return (w0p, sh0.reshape(1, -1), w1p, sh1.reshape(1, -1),
            p0, p1, wfcp, bfc.reshape(1, -1))


def _const_spec(shape):
    return pl.BlockSpec(shape, lambda i: (0,) * len(shape))


@jax.jit
def simple_nn_pallas(x_ncl, prepared):
    """x_ncl: (B, 3, L) NCL input (PyTorch layout) -> (B, num_classes)."""
    w0p, sh0, w1p, sh1, p0, p1, wfcp, bfc = prepared
    B, cin, L0 = x_ncl.shape
    K0, _, c0 = w0p.shape
    K1, _, c1 = w1p.shape
    n_cls = bfc.shape[-1]
    lo0, lo1 = L0 // 2, L0 // 4
    pad0, pad1 = K0 // 2, K1 // 2

    out = pl.pallas_call(
        fused_simple_nn_kernel,
        out_shape=jax.ShapeDtypeStruct((B, n_cls), jnp.float32),
        grid_spec=pltpu.PrefetchScalarGridSpec(
            num_scalar_prefetch=0,
            # Single grid step: the whole (tiny) batch is one block, so the
            # per-step pipeline overhead and writeback are amortized B times.
            # (On v7x: grid=(2,) "parallel" with B//2 per block would use both
            # TensorCores; on v5e/v6e a single step is strictly cheaper.)
            grid=(1,),
            in_specs=[
                _const_spec((B, cin, L0)),
                _const_spec((K0, cin, c0)),
                _const_spec((1, c0)),
                _const_spec((K1, c0, c1)),
                _const_spec((1, c1)),
                _const_spec((lo0, L0)),
                _const_spec((lo1, lo0)),
                _const_spec((lo1 * c1, n_cls)),
                _const_spec((1, n_cls)),
            ],
            out_specs=pl.BlockSpec((B, n_cls), lambda i: (0, 0)),
            scratch_shapes=[
                pltpu.VMEM((L0 + 2 * pad0, cin), jnp.float32),
                pltpu.VMEM((lo0 + 2 * pad1, c0), jnp.float32),
            ],
        ),
        compiler_params=pltpu.CompilerParams(
            dimension_semantics=("arbitrary",)),
    )(x_ncl, w0p, sh0, w1p, sh1, p0, p1, wfcp, bfc)
    return out


def simple_nn_reference(x, params, eps=1e-5):
    """Pure-JAX reference matching the PyTorch eval-mode forward pass."""
    (w0, b0, g0, be0, m0, v0,
     w1, b1, g1, be1, m1, v1, wfc, bfc) = params
    dn = ('NCH', 'OIH', 'NCH')

    def bn(y, g, b, m, v):
        return ((y - m[None, :, None]) / jnp.sqrt(v[None, :, None] + eps)
                * g[None, :, None] + b[None, :, None])

    def pool(y):
        B, C, L = y.shape
        return y.reshape(B, C, L // 2, 2).mean(-1)

    y = lax.conv_general_dilated(x, w0, (1,), 'SAME',
                                 dimension_numbers=dn) + b0[None, :, None]
    y = jnp.clip(pool(bn(y, g0, be0, m0, v0)), 0.0, 6.0)
    y = lax.conv_general_dilated(y, w1, (1,), 'SAME',
                                 dimension_numbers=dn) + b1[None, :, None]
    y = jnp.maximum(pool(bn(y, g1, be1, m1, v1)), 0.0)
    y = y.reshape(y.shape[0], -1)
    return y @ wfc.T + bfc[None, :]


if __name__ == "__main__":
    B = 2
    Cin, L = 3, 40            # module's input_shape=(3, 40)
    C0, K0 = 32, 3
    C1, K1 = 57, 5
    NCLS = 3

    key = jax.random.PRNGKey(0)
    ks = jax.random.split(key, 16)

    x = jax.random.normal(ks[0], (B, Cin, L), jnp.float32)

    # deterministic synthetic parameters (PyTorch layouts: conv (O, I, K), fc (N, D))
    w0 = 0.2 * jax.random.normal(ks[1], (C0, Cin, K0), jnp.float32)
    b0 = 0.1 * jax.random.normal(ks[2], (C0,), jnp.float32)
    g0 = 1.0 + 0.1 * jax.random.normal(ks[3], (C0,), jnp.float32)
    be0 = 0.1 * jax.random.normal(ks[4], (C0,), jnp.float32)
    m0 = 0.1 * jax.random.normal(ks[5], (C0,), jnp.float32)
    v0 = 1.0 + 0.1 * jnp.abs(jax.random.normal(ks[6], (C0,), jnp.float32))

    w1 = 0.1 * jax.random.normal(ks[7], (C1, C0, K1), jnp.float32)
    b1 = 0.1 * jax.random.normal(ks[8], (C1,), jnp.float32)
    g1 = 1.0 + 0.1 * jax.random.normal(ks[9], (C1,), jnp.float32)
    be1 = 0.1 * jax.random.normal(ks[10], (C1,), jnp.float32)
    m1 = 0.1 * jax.random.normal(ks[11], (C1,), jnp.float32)
    v1 = 1.0 + 0.1 * jnp.abs(jax.random.normal(ks[12], (C1,), jnp.float32))

    wfc = 0.05 * jax.random.normal(ks[13], (NCLS, C1 * (L // 4)), jnp.float32)
    bfc = 0.1 * jax.random.normal(ks[14], (NCLS,), jnp.float32)

    params = (w0, b0, g0, be0, m0, v0, w1, b1, g1, be1, m1, v1, wfc, bfc)

    prepared = jax.tree_util.tree_map(jax.block_until_ready,
                                      prepare_params(params))

    out = simple_nn_pallas(x, prepared)
    out = jax.block_until_ready(out)

    ref = simple_nn_reference(x, params)
    assert out.shape == (B, NCLS), out.shape
    assert jnp.allclose(out, ref, atol=1e-4, rtol=1e-4), (out, ref)

    print("KERNEL_OK")
</pallas_src>

<mosaic_0001>
module attributes {stable_mosaic.version = 11 : i64} {
  func.func @fused_simple_nn_kernel(%arg0: i32, %arg1: memref<2x3x40xf32, #tpu.memory_space<vmem>>, %arg2: memref<3x3x32xf32, #tpu.memory_space<vmem>>, %arg3: memref<1x32xf32, #tpu.memory_space<vmem>>, %arg4: memref<5x32x57xf32, #tpu.memory_space<vmem>>, %arg5: memref<1x57xf32, #tpu.memory_space<vmem>>, %arg6: memref<20x40xf32, #tpu.memory_space<vmem>>, %arg7: memref<10x20xf32, #tpu.memory_space<vmem>>, %arg8: memref<570x3xf32, #tpu.memory_space<vmem>>, %arg9: memref<1x3xf32, #tpu.memory_space<vmem>>, %arg10: memref<2x3xf32, #tpu.memory_space<vmem>>, %arg11: memref<42x3xf32, #tpu.memory_space<vmem>>, %arg12: memref<24x32xf32, #tpu.memory_space<vmem>>) attributes {dimension_semantics = [#tpu.dimension_semantics<arbitrary>], iteration_bounds = array<i64: 1>, scalar_prefetch = 0 : i64, scratch_operands = 2 : i64, tpu.core_type = #tpu.core_type<tc>, window_params = [{pipeline_mode = #tpu.pipeline_mode<synchronous>, transform_indices = @transform_0, window_bounds = array<i64: 2, 3, 40>}, {pipeline_mode = #tpu.pipeline_mode<synchronous>, transform_indices = @transform_1, window_bounds = array<i64: 3, 3, 32>}, {pipeline_mode = #tpu.pipeline_mode<synchronous>, transform_indices = @transform_2, window_bounds = array<i64: 1, 32>}, {pipeline_mode = #tpu.pipeline_mode<synchronous>, transform_indices = @transform_3, window_bounds = array<i64: 5, 32, 57>}, {pipeline_mode = #tpu.pipeline_mode<synchronous>, transform_indices = @transform_4, window_bounds = array<i64: 1, 57>}, {pipeline_mode = #tpu.pipeline_mode<synchronous>, transform_indices = @transform_5, window_bounds = array<i64: 20, 40>}, {pipeline_mode = #tpu.pipeline_mode<synchronous>, transform_indices = @transform_6, window_bounds = array<i64: 10, 20>}, {pipeline_mode = #tpu.pipeline_mode<synchronous>, transform_indices = @transform_7, window_bounds = array<i64: 570, 3>}, {pipeline_mode = #tpu.pipeline_mode<synchronous>, transform_indices = @transform_8, window_bounds = array<i64: 1, 3>}, {pipeline_mode = #tpu.pipeline_mode<synchronous>, transform_indices = @transform_9, window_bounds = array<i64: 2, 3>}]} {
    %cst = arith.constant 0.000000e+00 : f32
    %0 = vector.broadcast %cst : f32 to vector<1x3xf32>
    %c0 = arith.constant 0 : index
    %c0_0 = arith.constant 0 : index
    %1 = vector.load %arg11[%c0, %c0_0] : memref<42x3xf32, #tpu.memory_space<vmem>>, vector<1x3xf32>
    tpu.vector_store %arg11[%c0, %c0_0], %0 {strides = array<i32>} : memref<42x3xf32, #tpu.memory_space<vmem>>, vector<1x3xf32>,
    %cst_1 = arith.constant 0.000000e+00 : f32
    %2 = vector.broadcast %cst_1 : f32 to vector<1x3xf32>
    %c41 = arith.constant 41 : index
    %c0_2 = arith.constant 0 : index
    %3 = vector.load %arg11[%c41, %c0_2] : memref<42x3xf32, #tpu.memory_space<vmem>>, vector<1x3xf32>
    tpu.vector_store %arg11[%c41, %c0_2], %2 {strides = array<i32>} : memref<42x3xf32, #tpu.memory_space<vmem>>, vector<1x3xf32>,
    %cst_3 = arith.constant 0.000000e+00 : f32
    %4 = vector.broadcast %cst_3 : f32 to vector<2x32xf32>
    %c0_4 = arith.constant 0 : index
    %c0_5 = arith.constant 0 : index
    %5 = vector.load %arg12[%c0_4, %c0_5] : memref<24x32xf32, #tpu.memory_space<vmem>>, vector<2x32xf32>
    tpu.vector_store %arg12[%c0_4, %c0_5], %4 {strides = array<i32>} : memref<24x32xf32, #tpu.memory_space<vmem>>, vector<2x32xf32>,
    %cst_6 = arith.constant 0.000000e+00 : f32
    %6 = vector.broadcast %cst_6 : f32 to vector<2x32xf32>
    %c22 = arith.constant 22 : index
    %c0_7 = arith.constant 0 : index
    %7 = vector.load %arg12[%c22, %c0_7] : memref<24x32xf32, #tpu.memory_space<vmem>>, vector<2x32xf32>
    tpu.vector_store %arg12[%c22, %c0_7], %6 {strides = array<i32>} : memref<24x32xf32, #tpu.memory_space<vmem>>, vector<2x32xf32>,
    %c0_8 = arith.constant 0 : index
    %c0_9 = arith.constant 0 : index
    %c0_10 = arith.constant 0 : index
    %8 = vector.load %arg2[%c0_8, %c0_9, %c0_10] : memref<3x3x32xf32, #tpu.memory_space<vmem>>, vector<3x3x32xf32>
    %c0_11 = arith.constant 0 : index
    %c0_12 = arith.constant 0 : index
    %c0_13 = arith.constant 0 : index
    %9 = vector.load %arg4[%c0_11, %c0_12, %c0_13] : memref<5x32x57xf32, #tpu.memory_space<vmem>>, vector<5x32x57xf32>
    %c0_14 = arith.constant 0 : index
    %c0_15 = arith.constant 0 : index
    %10 = vector.load %arg3[%c0_14, %c0_15] : memref<1x32xf32, #tpu.memory_space<vmem>>, vector<1x32xf32>
    %c0_16 = arith.constant 0 : index
    %c0_17 = arith.constant 0 : index
    %11 = vector.load %arg5[%c0_16, %c0_17] : memref<1x57xf32, #tpu.memory_space<vmem>>, vector<1x57xf32>
    %c0_18 = arith.constant 0 : index
    %c0_19 = arith.constant 0 : index
    %12 = vector.load %arg6[%c0_18, %c0_19] : memref<20x40xf32, #tpu.memory_space<vmem>>, vector<20x40xf32>
    %c0_20 = arith.constant 0 : index
    %c0_21 = arith.constant 0 : index
    %13 = vector.load %arg7[%c0_20, %c0_21] : memref<10x20xf32, #tpu.memory_space<vmem>>, vector<10x20xf32>
    %c0_22 = arith.constant 0 : index
    %c0_23 = arith.constant 0 : index
    %c0_24 = arith.constant 0 : index
    %14 = vector.load %arg1[%c0_22, %c0_23, %c0_24] : memref<2x3x40xf32, #tpu.memory_space<vmem>>, vector<1x3x40xf32>
    %15 = vector.shape_cast %14 : vector<1x3x40xf32> to vector<3x40xf32>
    %16 = tpu.transpose %15, [1, 0] : vector<3x40xf32> -> vector<40x3xf32>
    %c1 = arith.constant 1 : index
    %c0_25 = arith.constant 0 : index
    %17 = vector.load %arg11[%c1, %c0_25] : memref<42x3xf32, #tpu.memory_space<vmem>>, vector<40x3xf32>
    tpu.vector_store %arg11[%c1, %c0_25], %16 {strides = array<i32>} : memref<42x3xf32, #tpu.memory_space<vmem>>, vector<40x3xf32>,
    %cst_26 = arith.constant 0.000000e+00 : f32
    %18 = vector.broadcast %cst_26 : f32 to vector<40x32xf32>
    %c0_27 = arith.constant 0 : index
    %c0_28 = arith.constant 0 : index
    %19 = vector.load %arg11[%c0_27, %c0_28] : memref<42x3xf32, #tpu.memory_space<vmem>>, vector<40x3xf32>
    %20 = vector.extract_strided_slice %8 {offsets = [0, 0, 0], sizes = [1, 3, 32], strides = [1, 1, 1]} : vector<3x3x32xf32> to vector<1x3x32xf32>
    %21 = vector.shape_cast %20 : vector<1x3x32xf32> to vector<3x32xf32>
    %cst_29 = arith.constant dense<0.000000e+00> : vector<40x32xf32>
    %22 = tpu.matmul %19, %21, %cst_29 {dimension_numbers = #tpu.dot_dimension_numbers<[1], [0], [0], [1], [0, 0, 1, 1], [], []>} : vector<40x3xf32>, vector<3x32xf32>, vector<40x32xf32> -> vector<40x32xf32>
    %23 = arith.addf %18, %22 : vector<40x32xf32>
    %c1_30 = arith.constant 1 : index
    %c0_31 = arith.constant 0 : index
    %24 = vector.load %arg11[%c1_30, %c0_31] : memref<42x3xf32, #tpu.memory_space<vmem>>, vector<40x3xf32>
    %25 = vector.extract_strided_slice %8 {offsets = [1, 0, 0], sizes = [1, 3, 32], strides = [1, 1, 1]} : vector<3x3x32xf32> to vector<1x3x32xf32>
    %26 = vector.shape_cast %25 : vector<1x3x32xf32> to vector<3x32xf32>
    %cst_32 = arith.constant dense<0.000000e+00> : vector<40x32xf32>
    %27 = tpu.matmul %24, %26, %cst_32 {dimension_numbers = #tpu.dot_dimension_numbers<[1], [0], [0], [1], [0, 0, 1, 1], [], []>} : vector<40x3xf32>, vector<3x32xf32>, vector<40x32xf32> -> vector<40x32xf32>
    %28 = arith.addf %23, %27 : vector<40x32xf32>
    %c2 = arith.constant 2 : index
    %c0_33 = arith.constant 0 : index
    %29 = vector.load %arg11[%c2, %c0_33] : memref<42x3xf32, #tpu.memory_space<vmem>>, vector<40x3xf32>
    %30 = vector.extract_strided_slice %8 {offsets = [2, 0, 0], sizes = [1, 3, 32], strides = [1, 1, 1]} : vector<3x3x32xf32> to vector<1x3x32xf32>
    %31 = vector.shape_cast %30 : vector<1x3x32xf32> to vector<3x32xf32>
    %cst_34 = arith.constant dense<0.000000e+00> : vector<40x32xf32>
    %32 = tpu.matmul %29, %31, %cst_34 {dimension_numbers = #tpu.dot_dimension_numbers<[1], [0], [0], [1], [0, 0, 1, 1], [], []>} : vector<40x3xf32>, vector<3x32xf32>, vector<40x32xf32> -> vector<40x32xf32>
    %33 = arith.addf %28, %32 : vector<40x32xf32>
    %cst_35 = arith.constant dense<0.000000e+00> : vector<20x32xf32>
    %34 = tpu.matmul %12, %33, %cst_35 {dimension_numbers = #tpu.dot_dimension_numbers<[1], [0], [0], [1], [0, 0, 1, 1], [], []>} : vector<20x40xf32>, vector<40x32xf32>, vector<20x32xf32> -> vector<20x32xf32>
    %35 = vector.broadcast %10 : vector<1x32xf32> to vector<20x32xf32>
    %36 = arith.addf %34, %35 : vector<20x32xf32>
    %cst_36 = arith.constant 0.000000e+00 : f32
    %cst_37 = arith.constant 6.000000e+00 : f32
    %37 = vector.broadcast %cst_36 : f32 to vector<20x32xf32>
    %38 = arith.maximumf %37, %36 : vector<20x32xf32>
    %39 = vector.broadcast %cst_37 : f32 to vector<20x32xf32>
    %40 = arith.minimumf %39, %38 : vector<20x32xf32>
    %c2_38 = arith.constant 2 : index
    %c0_39 = arith.constant 0 : index
    %41 = vector.load %arg12[%c2_38, %c0_39] : memref<24x32xf32, #tpu.memory_space<vmem>>, vector<20x32xf32>
    tpu.vector_store %arg12[%c2_38, %c0_39], %40 {strides = array<i32>} : memref<24x32xf32, #tpu.memory_space<vmem>>, vector<20x32xf32>,
    %cst_40 = arith.constant 0.000000e+00 : f32
    %42 = vector.broadcast %cst_40 : f32 to vector<20x57xf32>
    %c0_41 = arith.constant 0 : index
    %c0_42 = arith.constant 0 : index
    %43 = vector.load %arg12[%c0_41, %c0_42] : memref<24x32xf32, #tpu.memory_space<vmem>>, vector<20x32xf32>
    %44 = vector.extract_strided_slice %9 {offsets = [0, 0, 0], sizes = [1, 32, 57], strides = [1, 1, 1]} : vector<5x32x57xf32> to vector<1x32x57xf32>
    %45 = vector.shape_cast %44 : vector<1x32x57xf32> to vector<32x57xf32>
    %cst_43 = arith.constant dense<0.000000e+00> : vector<20x57xf32>
    %46 = tpu.matmul %43, %45, %cst_43 {dimension_numbers = #tpu.dot_dimension_numbers<[1], [0], [0], [1], [0, 0, 1, 1], [], []>} : vector<20x32xf32>, vector<32x57xf32>, vector<20x57xf32> -> vector<20x57xf32>
    %47 = arith.addf %42, %46 : vector<20x57xf32>
    %c1_44 = arith.constant 1 : index
    %c0_45 = arith.constant 0 : index
    %48 = vector.load %arg12[%c1_44, %c0_45] : memref<24x32xf32, #tpu.memory_space<vmem>>, vector<20x32xf32>
    %49 = vector.extract_strided_slice %9 {offsets = [1, 0, 0], sizes = [1, 32, 57], strides = [1, 1, 1]} : vector<5x32x57xf32> to vector<1x32x57xf32>
    %50 = vector.shape_cast %49 : vector<1x32x57xf32> to vector<32x57xf32>
    %cst_46 = arith.constant dense<0.000000e+00> : vector<20x57xf32>
    %51 = tpu.matmul %48, %50, %cst_46 {dimension_numbers = #tpu.dot_dimension_numbers<[1], [0], [0], [1], [0, 0, 1, 1], [], []>} : vector<20x32xf32>, vector<32x57xf32>, vector<20x57xf32> -> vector<20x57xf32>
    %52 = arith.addf %47, %51 : vector<20x57xf32>
    %c2_47 = arith.constant 2 : index
    %c0_48 = arith.constant 0 : index
    %53 = vector.load %arg12[%c2_47, %c0_48] : memref<24x32xf32, #tpu.memory_space<vmem>>, vector<20x32xf32>
    %54 = vector.extract_strided_slice %9 {offsets = [2, 0, 0], sizes = [1, 32, 57], strides = [1, 1, 1]} : vector<5x32x57xf32> to vector<1x32x57xf32>
    %55 = vector.shape_cast %54 : vector<1x32x57xf32> to vector<32x57xf32>
    %cst_49 = arith.constant dense<0.000000e+00> : vector<20x57xf32>
    %56 = tpu.matmul %53, %55, %cst_49 {dimension_numbers = #tpu.dot_dimension_numbers<[1], [0], [0], [1], [0, 0, 1, 1], [], []>} : vector<20x32xf32>, vector<32x57xf32>, vector<20x57xf32> -> vector<20x57xf32>
    %57 = arith.addf %52, %56 : vector<20x57xf32>
    %c3 = arith.constant 3 : index
    %c0_50 = arith.constant 0 : index
    %58 = vector.load %arg12[%c3, %c0_50] : memref<24x32xf32, #tpu.memory_space<vmem>>, vector<20x32xf32>
    %59 = vector.extract_strided_slice %9 {offsets = [3, 0, 0], sizes = [1, 32, 57], strides = [1, 1, 1]} : vector<5x32x57xf32> to vector<1x32x57xf32>
    %60 = vector.shape_cast %59 : vector<1x32x57xf32> to vector<32x57xf32>
    %cst_51 = arith.constant dense<0.000000e+00> : vector<20x57xf32>
    %61 = tpu.matmul %58, %60, %cst_51 {dimension_numbers = #tpu.dot_dimension_numbers<[1], [0], [0], [1], [0, 0, 1, 1], [], []>} : vector<20x32xf32>, vector<32x57xf32>, vector<20x57xf32> -> vector<20x57xf32>
    %62 = arith.addf %57, %61 : vector<20x57xf32>
    %c4 = arith.constant 4 : index
    %c0_52 = arith.constant 0 : index
    %63 = vector.load %arg12[%c4, %c0_52] : memref<24x32xf32, #tpu.memory_space<vmem>>, vector<20x32xf32>
    %64 = vector.extract_strided_slice %9 {offsets = [4, 0, 0], sizes = [1, 32, 57], strides = [1, 1, 1]} : vector<5x32x57xf32> to vector<1x32x57xf32>
    %65 = vector.shape_cast %64 : vector<1x32x57xf32> to vector<32x57xf32>
    %cst_53 = arith.constant dense<0.000000e+00> : vector<20x57xf32>
    %66 = tpu.matmul %63, %65, %cst_53 {dimension_numbers = #tpu.dot_dimension_numbers<[1], [0], [0], [1], [0, 0, 1, 1], [], []>} : vector<20x32xf32>, vector<32x57xf32>, vector<20x57xf32> -> vector<20x57xf32>
    %67 = arith.addf %62, %66 : vector<20x57xf32>
    %cst_54 = arith.constant dense<0.000000e+00> : vector<10x57xf32>
    %68 = tpu.matmul %13, %67, %cst_54 {dimension_numbers = #tpu.dot_dimension_numbers<[1], [0], [0], [1], [0, 0, 1, 1], [], []>} : vector<10x20xf32>, vector<20x57xf32>, vector<10x57xf32> -> vector<10x57xf32>
    %69 = vector.broadcast %11 : vector<1x57xf32> to vector<10x57xf32>
    %70 = arith.addf %68, %69 : vector<10x57xf32>
    %cst_55 = arith.constant 0.000000e+00 : f32
    %71 = vector.broadcast %cst_55 : f32 to vector<10x57xf32>
    %72 = arith.maximumf %70, %71 : vector<10x57xf32>
    %73 = vector.extract_strided_slice %72 {offsets = [0, 0], sizes = [1, 57], strides = [1, 1]} : vector<10x57xf32> to vector<1x57xf32>
    %74 = vector.extract_strided_slice %72 {offsets = [1, 0], sizes = [1, 57], strides = [1, 1]} : vector<10x57xf32> to vector<1x57xf32>
    %75 = vector.extract_strided_slice %72 {offsets = [2, 0], sizes = [1, 57], strides = [1, 1]} : vector<10x57xf32> to vector<1x57xf32>
    %76 = vector.extract_strided_slice %72 {offsets = [3, 0], sizes = [1, 57], strides = [1, 1]} : vector<10x57xf32> to vector<1x57xf32>
    %77 = vector.extract_strided_slice %72 {offsets = [4, 0], sizes = [1, 57], strides = [1, 1]} : vector<10x57xf32> to vector<1x57xf32>
    %78 = vector.extract_strided_slice %72 {offsets = [5, 0], sizes = [1, 57], strides = [1, 1]} : vector<10x57xf32> to vector<1x57xf32>
    %79 = vector.extract_strided_slice %72 {offsets = [6, 0], sizes = [1, 57], strides = [1, 1]} : vector<10x57xf32> to vector<1x57xf32>
    %80 = vector.extract_strided_slice %72 {offsets = [7, 0], sizes = [1, 57], strides = [1, 1]} : vector<10x57xf32> to vector<1x57xf32>
    %81 = vector.extract_strided_slice %72 {offsets = [8, 0], sizes = [1, 57], strides = [1, 1]} : vector<10x57xf32> to vector<1x57xf32>
    %82 = vector.extract_strided_slice %72 {offsets = [9, 0], sizes = [1, 57], strides = [1, 1]} : vector<10x57xf32> to vector<1x57xf32>
    %83 = tpu.concatenate %73, %74, %75, %76, %77, %78, %79, %80, %81, %82 in 1 : vector<1x57xf32>, vector<1x57xf32>, vector<1x57xf32>, vector<1x57xf32>, vector<1x57xf32>, vector<1x57xf32>, vector<1x57xf32>, vector<1x57xf32>, vector<1x57xf32>, vector<1x57xf32> -> vector<1x570xf32>
    %c1_56 = arith.constant 1 : index
    %c0_57 = arith.constant 0 : index
    %c0_58 = arith.constant 0 : index
    %84 = vector.load %arg1[%c1_56, %c0_57, %c0_58] : memref<2x3x40xf32, #tpu.memory_space<vmem>>, vector<1x3x40xf32>
    %85 = vector.shape_cast %84 : vector<1x3x40xf32> to vector<3x40xf32>
    %86 = tpu.transpose %85, [1, 0] : vector<3x40xf32> -> vector<40x3xf32>
    %c1_59 = arith.constant 1 : index
    %c0_60 = arith.constant 0 : index
    %87 = vector.load %arg11[%c1_59, %c0_60] : memref<42x3xf32, #tpu.memory_space<vmem>>, vector<40x3xf32>
    tpu.vector_store %arg11[%c1_59, %c0_60], %86 {strides = array<i32>} : memref<42x3xf32, #tpu.memory_space<vmem>>, vector<40x3xf32>,
    %cst_61 = arith.constant 0.000000e+00 : f32
    %88 = vector.broadcast %cst_61 : f32 to vector<40x32xf32>
    %c0_62 = arith.constant 0 : index
    %c0_63 = arith.constant 0 : index
    %89 = vector.load %arg11[%c0_62, %c0_63] : memref<42x3xf32, #tpu.memory_space<vmem>>, vector<40x3xf32>
    %90 = vector.extract_strided_slice %8 {offsets = [0, 0, 0], sizes = [1, 3, 32], strides = [1, 1, 1]} : vector<3x3x32xf32> to vector<1x3x32xf32>
    %91 = vector.shape_cast %90 : vector<1x3x32xf32> to vector<3x32xf32>
    %cst_64 = arith.constant dense<0.000000e+00> : vector<40x32xf32>
    %92 = tpu.matmul %89, %91, %cst_64 {dimension_numbers = #tpu.dot_dimension_numbers<[1], [0], [0], [1], [0, 0, 1, 1], [], []>} : vector<40x3xf32>, vector<3x32xf32>, vector<40x32xf32> -> vector<40x32xf32>
    %93 = arith.addf %88, %92 : vector<40x32xf32>
    %c1_65 = arith.constant 1 : index
    %c0_66 = arith.constant 0 : index
    %94 = vector.load %arg11[%c1_65, %c0_66] : memref<42x3xf32, #tpu.memory_space<vmem>>, vector<40x3xf32>
    %95 = vector.extract_strided_slice %8 {offsets = [1, 0, 0], sizes = [1, 3, 32], strides = [1, 1, 1]} : vector<3x3x32xf32> to vector<1x3x32xf32>
    %96 = vector.shape_cast %95 : vector<1x3x32xf32> to vector<3x32xf32>
    %cst_67 = arith.constant dense<0.000000e+00> : vector<40x32xf32>
    %97 = tpu.matmul %94, %96, %cst_67 {dimension_numbers = #tpu.dot_dimension_numbers<[1], [0], [0], [1], [0, 0, 1, 1], [], []>} : vector<40x3xf32>, vector<3x32xf32>, vector<40x32xf32> -> vector<40x32xf32>
    %98 = arith.addf %93, %97 : vector<40x32xf32>
    %c2_68 = arith.constant 2 : index
    %c0_69 = arith.constant 0 : index
    %99 = vector.load %arg11[%c2_68, %c0_69] : memref<42x3xf32, #tpu.memory_space<vmem>>, vector<40x3xf32>
    %100 = vector.extract_strided_slice %8 {offsets = [2, 0, 0], sizes = [1, 3, 32], strides = [1, 1, 1]} : vector<3x3x32xf32> to vector<1x3x32xf32>
    %101 = vector.shape_cast %100 : vector<1x3x32xf32> to vector<3x32xf32>
    %cst_70 = arith.constant dense<0.000000e+00> : vector<40x32xf32>
    %102 = tpu.matmul %99, %101, %cst_70 {dimension_numbers = #tpu.dot_dimension_numbers<[1], [0], [0], [1], [0, 0, 1, 1], [], []>} : vector<40x3xf32>, vector<3x32xf32>, vector<40x32xf32> -> vector<40x32xf32>
    %103 = arith.addf %98, %102 : vector<40x32xf32>
    %cst_71 = arith.constant dense<0.000000e+00> : vector<20x32xf32>
    %104 = tpu.matmul %12, %103, %cst_71 {dimension_numbers = #tpu.dot_dimension_numbers<[1], [0], [0], [1], [0, 0, 1, 1], [], []>} : vector<20x40xf32>, vector<40x32xf32>, vector<20x32xf32> -> vector<20x32xf32>
    %105 = vector.broadcast %10 : vector<1x32xf32> to vector<20x32xf32>
    %106 = arith.addf %104, %105 : vector<20x32xf32>
    %cst_72 = arith.constant 0.000000e+00 : f32
    %cst_73 = arith.constant 6.000000e+00 : f32
    %107 = vector.broadcast %cst_72 : f32 to vector<20x32xf32>
    %108 = arith.maximumf %107, %106 : vector<20x32xf32>
    %109 = vector.broadcast %cst_73 : f32 to vector<20x32xf32>
    %110 = arith.minimumf %109, %108 : vector<20x32xf32>
    %c2_74 = arith.constant 2 : index
    %c0_75 = arith.constant 0 : index
    %111 = vector.load %arg12[%c2_74, %c0_75] : memref<24x32xf32, #tpu.memory_space<vmem>>, vector<20x32xf32>
    tpu.vector_store %arg12[%c2_74, %c0_75], %110 {strides = array<i32>} : memref<24x32xf32, #tpu.memory_space<vmem>>, vector<20x32xf32>,
    %cst_76 = arith.constant 0.000000e+00 : f32
    %112 = vector.broadcast %cst_76 : f32 to vector<20x57xf32>
    %c0_77 = arith.constant 0 : index
    %c0_78 = arith.constant 0 : index
    %113 = vector.load %arg12[%c0_77, %c0_78] : memref<24x32xf32, #tpu.memory_space<vmem>>, vector<20x32xf32>
    %114 = vector.extract_strided_slice %9 {offsets = [0, 0, 0], sizes = [1, 32, 57], strides = [1, 1, 1]} : vector<5x32x57xf32> to vector<1x32x57xf32>
    %115 = vector.shape_cast %114 : vector<1x32x57xf32> to vector<32x57xf32>
    %cst_79 = arith.constant dense<0.000000e+00> : vector<20x57xf32>
    %116 = tpu.matmul %113, %115, %cst_79 {dimension_numbers = #tpu.dot_dimension_numbers<[1], [0], [0], [1], [0, 0, 1, 1], [], []>} : vector<20x32xf32>, vector<32x57xf32>, vector<20x57xf32> -> vector<20x57xf32>
    %117 = arith.addf %112, %116 : vector<20x57xf32>
    %c1_80 = arith.constant 1 : index
    %c0_81 = arith.constant 0 : index
    %118 = vector.load %arg12[%c1_80, %c0_81] : memref<24x32xf32, #tpu.memory_space<vmem>>, vector<20x32xf32>
    %119 = vector.extract_strided_slice %9 {offsets = [1, 0, 0], sizes = [1, 32, 57], strides = [1, 1, 1]} : vector<5x32x57xf32> to vector<1x32x57xf32>
    %120 = vector.shape_cast %119 : vector<1x32x57xf32> to vector<32x57xf32>
    %cst_82 = arith.constant dense<0.000000e+00> : vector<20x57xf32>
    %121 = tpu.matmul %118, %120, %cst_82 {dimension_numbers = #tpu.dot_dimension_numbers<[1], [0], [0], [1], [0, 0, 1, 1], [], []>} : vector<20x32xf32>, vector<32x57xf32>, vector<20x57xf32> -> vector<20x57xf32>
    %122 = arith.addf %117, %121 : vector<20x57xf32>
    %c2_83 = arith.constant 2 : index
    %c0_84 = arith.constant 0 : index
    %123 = vector.load %arg12[%c2_83, %c0_84] : memref<24x32xf32, #tpu.memory_space<vmem>>, vector<20x32xf32>
    %124 = vector.extract_strided_slice %9 {offsets = [2, 0, 0], sizes = [1, 32, 57], strides = [1, 1, 1]} : vector<5x32x57xf32> to vector<1x32x57xf32>
    %125 = vector.shape_cast %124 : vector<1x32x57xf32> to vector<32x57xf32>
    %cst_85 = arith.constant dense<0.000000e+00> : vector<20x57xf32>
    %126 = tpu.matmul %123, %125, %cst_85 {dimension_numbers = #tpu.dot_dimension_numbers<[1], [0], [0], [1], [0, 0, 1, 1], [], []>} : vector<20x32xf32>, vector<32x57xf32>, vector<20x57xf32> -> vector<20x57xf32>
    %127 = arith.addf %122, %126 : vector<20x57xf32>
    %c3_86 = arith.constant 3 : index
    %c0_87 = arith.constant 0 : index
    %128 = vector.load %arg12[%c3_86, %c0_87] : memref<24x32xf32, #tpu.memory_space<vmem>>, vector<20x32xf32>
    %129 = vector.extract_strided_slice %9 {offsets = [3, 0, 0], sizes = [1, 32, 57], strides = [1, 1, 1]} : vector<5x32x57xf32> to vector<1x32x57xf32>
    %130 = vector.shape_cast %129 : vector<1x32x57xf32> to vector<32x57xf32>
    %cst_88 = arith.constant dense<0.000000e+00> : vector<20x57xf32>
    %131 = tpu.matmul %128, %130, %cst_88 {dimension_numbers = #tpu.dot_dimension_numbers<[1], [0], [0], [1], [0, 0, 1, 1], [], []>} : vector<20x32xf32>, vector<32x57xf32>, vector<20x57xf32> -> vector<20x57xf32>
    %132 = arith.addf %127, %131 : vector<20x57xf32>
    %c4_89 = arith.constant 4 : index
    %c0_90 = arith.constant 0 : index
    %133 = vector.load %arg12[%c4_89, %c0_90] : memref<24x32xf32, #tpu.memory_space<vmem>>, vector<20x32xf32>
    %134 = vector.extract_strided_slice %9 {offsets = [4, 0, 0], sizes = [1, 32, 57], strides = [1, 1, 1]} : vector<5x32x57xf32> to vector<1x32x57xf32>
    %135 = vector.shape_cast %134 : vector<1x32x57xf32> to vector<32x57xf32>
    %cst_91 = arith.constant dense<0.000000e+00> : vector<20x57xf32>
    %136 = tpu.matmul %133, %135, %cst_91 {dimension_numbers = #tpu.dot_dimension_numbers<[1], [0], [0], [1], [0, 0, 1, 1], [], []>} : vector<20x32xf32>, vector<32x57xf32>, vector<20x57xf32> -> vector<20x57xf32>
    %137 = arith.addf %132, %136 : vector<20x57xf32>
    %cst_92 = arith.constant dense<0.000000e+00> : vector<10x57xf32>
    %138 = tpu.matmul %13, %137, %cst_92 {dimension_numbers = #tpu.dot_dimension_numbers<[1], [0], [0], [1], [0, 0, 1, 1], [], []>} : vector<10x20xf32>, vector<20x57xf32>, vector<10x57xf32> -> vector<10x57xf32>
    %139 = vector.broadcast %11 : vector<1x57xf32> to vector<10x57xf32>
    %140 = arith.addf %138, %139 : vector<10x57xf32>
    %cst_93 = arith.constant 0.000000e+00 : f32
    %141 = vector.broadcast %cst_93 : f32 to vector<10x57xf32>
    %142 = arith.maximumf %140, %141 : vector<10x57xf32>
    %143 = vector.extract_strided_slice %142 {offsets = [0, 0], sizes = [1, 57], strides = [1, 1]} : vector<10x57xf32> to vector<1x57xf32>
    %144 = vector.extract_strided_slice %142 {offsets = [1, 0], sizes = [1, 57], strides = [1, 1]} : vector<10x57xf32> to vector<1x57xf32>
    %145 = vector.extract_strided_slice %142 {offsets = [2, 0], sizes = [1, 57], strides = [1, 1]} : vector<10x57xf32> to vector<1x57xf32>
    %146 = vector.extract_strided_slice %142 {offsets = [3, 0], sizes = [1, 57], strides = [1, 1]} : vector<10x57xf32> to vector<1x57xf32>
    %147 = vector.extract_strided_slice %142 {offsets = [4, 0], sizes = [1, 57], strides = [1, 1]} : vector<10x57xf32> to vector<1x57xf32>
    %148 = vector.extract_strided_slice %142 {offsets = [5, 0], sizes = [1, 57], strides = [1, 1]} : vector<10x57xf32> to vector<1x57xf32>
    %149 = vector.extract_strided_slice %142 {offsets = [6, 0], sizes = [1, 57], strides = [1, 1]} : vector<10x57xf32> to vector<1x57xf32>
    %150 = vector.extract_strided_slice %142 {offsets = [7, 0], sizes = [1, 57], strides = [1, 1]} : vector<10x57xf32> to vector<1x57xf32>
    %151 = vector.extract_strided_slice %142 {offsets = [8, 0], sizes = [1, 57], strides = [1, 1]} : vector<10x57xf32> to vector<1x57xf32>
    %152 = vector.extract_strided_slice %142 {offsets = [9, 0], sizes = [1, 57], strides = [1, 1]} : vector<10x57xf32> to vector<1x57xf32>
    %153 = tpu.concatenate %143, %144, %145, %146, %147, %148, %149, %150, %151, %152 in 1 : vector<1x57xf32>, vector<1x57xf32>, vector<1x57xf32>, vector<1x57xf32>, vector<1x57xf32>, vector<1x57xf32>, vector<1x57xf32>, vector<1x57xf32>, vector<1x57xf32>, vector<1x57xf32> -> vector<1x570xf32>
    %154 = tpu.concatenate %83, %153 in 0 : vector<1x570xf32>, vector<1x570xf32> -> vector<2x570xf32>
    %c0_94 = arith.constant 0 : index
    %c0_95 = arith.constant 0 : index
    %155 = vector.load %arg8[%c0_94, %c0_95] : memref<570x3xf32, #tpu.memory_space<vmem>>, vector<570x3xf32>
    %cst_96 = arith.constant dense<0.000000e+00> : vector<2x3xf32>
    %156 = tpu.matmul %154, %155, %cst_96 {dimension_numbers = #tpu.dot_dimension_numbers<[1], [0], [0], [1], [0, 0, 1, 1], [], []>} : vector<2x570xf32>, vector<570x3xf32>, vector<2x3xf32> -> vector<2x3xf32>
    %c0_97 = arith.constant 0 : index
    %c0_98 = arith.constant 0 : index
    %157 = vector.load %arg9[%c0_97, %c0_98] : memref<1x3xf32, #tpu.memory_space<vmem>>, vector<1x3xf32>
    %158 = vector.broadcast %157 : vector<1x3xf32> to vector<2x3xf32>
    %159 = arith.addf %156, %158 : vector<2x3xf32>
    %c0_99 = arith.constant 0 : index
    %c0_100 = arith.constant 0 : index
    %160 = vector.load %arg10[%c0_99, %c0_100] : memref<2x3xf32, #tpu.memory_space<vmem>>, vector<2x3xf32>
    tpu.vector_store %arg10[%c0_99, %c0_100], %159 {strides = array<i32>} : memref<2x3xf32, #tpu.memory_space<vmem>>, vector<2x3xf32>,
    return
  }
  func.func @transform_0(%arg0: i32) -> (i32, i32, i32) {
    %c0_i32 = arith.constant 0 : i32
    %c0_i32_0 = arith.constant 0 : i32
    %c0_i32_1 = arith.constant 0 : i32
    %c0_i32_2 = arith.constant 0 : i32
    return %c0_i32, %c0_i32_0, %c0_i32_1 : i32, i32, i32
  }
  func.func @transform_1(%arg0: i32) -> (i32, i32, i32) {
    %c0_i32 = arith.constant 0 : i32
    %c0_i32_0 = arith.constant 0 : i32
    %c0_i32_1 = arith.constant 0 : i32
    %c0_i32_2 = arith.constant 0 : i32
    return %c0_i32, %c0_i32_0, %c0_i32_1 : i32, i32, i32
  }
  func.func @transform_2(%arg0: i32) -> (i32, i32) {
    %c0_i32 = arith.constant 0 : i32
    %c0_i32_0 = arith.constant 0 : i32
    %c0_i32_1 = arith.constant 0 : i32
    return %c0_i32, %c0_i32_0 : i32, i32
  }
  func.func @transform_3(%arg0: i32) -> (i32, i32, i32) {
    %c0_i32 = arith.constant 0 : i32
    %c0_i32_0 = arith.constant 0 : i32
    %c0_i32_1 = arith.constant 0 : i32
    %c0_i32_2 = arith.constant 0 : i32
    return %c0_i32, %c0_i32_0, %c0_i32_1 : i32, i32, i32
  }
  func.func @transform_4(%arg0: i32) -> (i32, i32) {
    %c0_i32 = arith.constant 0 : i32
    %c0_i32_0 = arith.constant 0 : i32
    %c0_i32_1 = arith.constant 0 : i32
    return %c0_i32, %c0_i32_0 : i32, i32
  }
  func.func @transform_5(%arg0: i32) -> (i32, i32) {
    %c0_i32 = arith.constant 0 : i32
    %c0_i32_0 = arith.constant 0 : i32
    %c0_i32_1 = arith.constant 0 : i32
    return %c0_i32, %c0_i32_0 : i32, i32
  }
  func.func @transform_6(%arg0: i32) -> (i32, i32) {
    %c0_i32 = arith.constant 0 : i32
    %c0_i32_0 = arith.constant 0 : i32
    %c0_i32_1 = arith.constant 0 : i32
    return %c0_i32, %c0_i32_0 : i32, i32
  }
  func.func @transform_7(%arg0: i32) -> (i32, i32) {
    %c0_i32 = arith.constant 0 : i32
    %c0_i32_0 = arith.constant 0 : i32
    %c0_i32_1 = arith.constant 0 : i32
    return %c0_i32, %c0_i32_0 : i32, i32
  }
  func.func @transform_8(%arg0: i32) -> (i32, i32) {
    %c0_i32 = arith.constant 0 : i32
    %c0_i32_0 = arith.constant 0 : i32
    %c0_i32_1 = arith.constant 0 : i32
    return %c0_i32, %c0_i32_0 : i32, i32
  }
  func.func @transform_9(%arg0: i32) -> (i32, i32) {
    %c0_i32 = arith.constant 0 : i32
    %c0_i32_0 = arith.constant 0 : i32
    %c0_i32_1 = arith.constant 0 : i32
    return %c0_i32, %c0_i32_0 : i32, i32
  }
}

</mosaic_0001>

<bundles_post_ra>
// kernel: simple_nn_pallas.1
= control target key start
LH: loop header
LB: loop body
LE: loop exit
PB: predicated region body
PF: predicated region fallthrough
CT: control target
= control target key end

     0   :  { %s2161_s0 = inlined_call_operand.vmem [shape: f32[2,3,40], index: 0, kind: input, shape index: {}]   ;;  %s2162_s1 = inlined_call_operand.vmem [shape: f32[3,3,32], index: 1, kind: input, shape index: {}]   ;;  %s2163_s2 = inlined_call_operand.vmem [shape: f32[1,32], index: 2, kind: input, shape index: {}]   ;;  %s2164_s3 = inlined_call_operand.vmem [shape: f32[5,32,57], index: 3, kind: input, shape index: {}]   ;;  %s2165_s4 = inlined_call_operand.vmem [shape: f32[1,57], index: 4, kind: input, shape index: {}]   ;;  %s2166_s5 = inlined_call_operand.vmem [shape: f32[20,40], index: 5, kind: input, shape index: {}]   ;;  %s2167_s6 = inlined_call_operand.vmem [shape: f32[10,20], index: 6, kind: input, shape index: {}]   ;;  %s2168_s7 = inlined_call_operand.vmem [shape: f32[570,3], index: 7, kind: input, shape index: {}]   ;;  %s2169_s8 = inlined_call_operand.vmem [shape: f32[1,3], index: 8, kind: input, shape index: {}]   ;;  %s2170_s9 = inlined_call_operand.hbm [shape: f32[2,3], index: 9, kind: output, shape index: {}]  }
   0x1   :  { %v69_v0 = vld [vmem:[%s2161_s0] sm:$0x7] }
   0x2   :  { %70 = vxpose.xlu0.b32.start.end [1/1] (short) (narrow) %v69_v0, 40 }
   0x3   :  { %14 = vsyncpa [#allocation5], 0  ;;  %vm33_vm0 = vcmask 16384   ;;  %v1509_v1 = vmov 0.0   ;;  %v1578_v2 = vld [vmem:[%s2162_s1 + $0x4] sm:$0x7] }
   0x4   :  { %34 = vst.msk [vmem:[#allocation2] sm:$0x1] %vm33_vm0, %v1509_v1  ;;  %vm133_vm1 = vcmask 1042432   ;;  %v1583_v3 = vld [vmem:[%s2162_s1] sm:$0x7]  ;;  %vm102_vm2 = vcmask 23552  }
   0x5   :  { %35 = vst.msk [vmem:[#allocation2 + $0x29] sm:$0x1] %vm33_vm0, %v1509_v1  ;;  %1353 = vmatpush.msk.msra.mxu0 %vm133_vm1, %v1578_v2  ;;  %1359 = vmatpush.msk.msra.mxu1 %vm133_vm1, %v1583_v3  ;;  %v1592_v4 = vld [vmem:[%s2162_s1 + $0x8] sm:$0x7]  ;;  %v1619_v50 = vld [vmem:[%s2166_s5] sm:$0xff]  ;;  %vm282_vm3 = vcmask 326656  }
   0x6   :  { %1365 = vmatpush.msk.msra.mxu2 %vm133_vm1, %v1592_v4  ;;  %v1626_v51 = vld [vmem:[%s2166_s5 + $0x8] sm:$0xff]  ;;  %v1633_v52 = vld [vmem:[%s2166_s5 + $0x10] sm:$0xf]  ;;  %vm36_vm4 = vcmask 254976   ;;  %v1640_v53 = vld [vmem:[%s2164_s3 + $0x38] sm:$0xff]  ;;  %vm324_vm5 = vcmask 261120  }
   0x7   :  { %v1645_v54 = vld [vmem:[%s2164_s3 + $0x18] sm:$0xff]  ;;  %37 = vst.msk [vmem:[#allocation3] sm:$0x3] %vm36_vm4, %v1509_v1  ;;  %v48_v56 = vld [vmem:[%s2164_s3 + $0x30] sm:$0xff]  ;;  %v47_v59 = vld [vmem:[%s2164_s3 + $0x28] sm:$0xff]  ;;  %vm327_vm6 = vcmask 257024  }
   0x8   :  { %v1650_v55 = vld [vmem:[%s2164_s3 + $0x58] sm:$0xff]  ;;  %391 = vmatpush.msrb.mxu0 %v1645_v54  ;;  %38 = vst.msk [vmem:[#allocation3 + $0x16] sm:$0x3] %vm36_vm4, %v1509_v1  ;;  %v1663_v57 = vld [vmem:[%s2164_s3 + $0x10] sm:$0xff]  ;;  %v1678_v60 = vld [vmem:[%s2164_s3 + $0x8] sm:$0xff]  ;;  %vm538_vm7 = vcmask 1043456  }
   0x9   :  { %429 = vmatpush.msrb.mxu1 %v1650_v55  ;;  %v1668_v58 = vld [vmem:[%s2164_s3 + $0x50] sm:$0xff]  ;;  %v1683_v61 = vld [vmem:[%s2164_s3 + $0x48] sm:$0xff]  ;;  %v46_v62 = vld [vmem:[%s2164_s3 + $0x20] sm:$0xff]  ;;  %vm531_vm8 = vcmask 162816   ;;  %s1510_s22 = smov 72   ;;  %s1512_s23 = smov 57  }
   0xa   :  { %392 = vmatpush.msrb.mxu0 %v1663_v57  ;;  %v1693_v63 = vld [vmem:[%s2164_s3] sm:$0xff]  ;;  %v1705_v1 = vld [vmem:[%s2164_s3 + $0x78] sm:$0xff]  ;;  %s1513_s24 = smov 15   ;;  %s1514_s25 = smov 114   ;;  %vm1231_vm9 = vcmask 1041408   ;;  %vm604_vm10 = vcmask 465920  }
   0xb   :  { %430 = vmatpush.msrb.mxu1 %v1668_v58  ;;  %v1698_v0 = vld [vmem:[%s2164_s3 + $0x40] sm:$0xff]  ;;  %470 = vmatpush.msrb.mxu2 %v1705_v1  ;;  %s1515_s26 = smov 43   ;;  %s1516_s27 = smov 100   ;;  %vm612_vm11 = vcmask 236544   ;;  %vm614_vm12 = vcmask 703488   ;;  %vm606_vm13 = vcmask 932864  }
   0xc   :  { %393 = vmatpush.msrb.mxu0 %v1678_v60  ;;  %s1517_s5 = smov 1   ;;  %s1518_s28 = smov 29   ;;  %vm608_vm14 = vcmask 351232   ;;  %vm1145_vm15 = vcmask 1040384   ;;  %vm610_vm0 = vcmask 818176   ;;  %vm1227_vm4 = vcmask 474112  }
   0xd   :  { %431 = vmatpush.msrb.mxu1 %v1683_v61  ;;  %s1519_s13 = smov [#allocation4]   ;;  %s1344_s16 = sshll.u32 %s2170_s9, 4  ;;  %s1345_s16 = int_to_ptr.hbm [resolvable:$true] %s1344_s16 }
   0xe   :  { %394 = vmatpush.msrb.mxu0 %v1693_v63  ;;  %s1342_s14 = sshll.u32 %s1519_s13, 4  ;;  %s1343_s14 = int_to_ptr.vmem [resolvable:$true] %s1342_s14 }
   0xf   :  { %432 = vmatpush.msrb.mxu1 %v1698_v0 }
  0xa6   :  { %v86_v5 = vpop.trf.xlu0 }
  0xa7   :  { %103 = vst.msk [vmem:[#allocation2 + $0x1] sm:$0xff] %vm102_vm2, %v86_v5  ;;  %v1713_v5 = vld [vmem:[%s2164_s3 + $0x70] sm:$0xff] }
  0xa8   :  { %471 = vmatpush.msrb.mxu2 %v1713_v5 }
  0xae   :  { %v87_v6 = vpop.trf.xlu0  ;;  %v113_v7 = vld [vmem:[#allocation2 + $0x1] sm:$0xff] }
  0xaf   :  { %v108_v8 = vld [vmem:[#allocation2] sm:$0xff]  ;;  %104 = vst.msk [vmem:[#allocation2 + $0x9] sm:$0xff] %vm102_vm2, %v87_v6  ;;  %1354 = vmatmul.msk.f32.vlgmr.msra.gmra.mxu0 %vm102_vm2, %v113_v7  ;;  %v1719_v6 = vld [vmem:[%s2164_s3 + $0x68] sm:$0xff] }
  0xb0   :  { %1360 = vmatmul.msk.f32.vlgmr.msra.gmra.mxu1 %vm102_vm2, %v108_v8  ;;  %472 = vmatpush.msrb.mxu2 %v1719_v6  ;;  %v1728_v7 = vld [vmem:[%s2164_s3 + $0x60] sm:$0xff] }
  0xb1   :  { %1393 = vmatpush.msk.msra.mxu1 %vm133_vm1, %v1578_v2  ;;  %v1392_v2 = vld [vmem:[%s2161_s0 + $0x4] sm:$0x7]  ;;  %v1736_v8 = vld [vmem:[%s2163_s2] ss:$0 sm:$0xff] }
  0xb2   :  { %624 = vxpose.xlu0.b32.start.end [1/1] (short) (narrow) %v1392_v2, 40  ;;  %473 = vmatpush.msrb.mxu2 %v1728_v7 }
  0xb6   :  { %v88_v9 = vpop.trf.xlu0  ;;  %v114_v10 = vld [vmem:[#allocation2 + $0x9] sm:$0xff] }
  0xb7   :  { %v109_v11 = vld [vmem:[#allocation2 + $0x8] sm:$0xff]  ;;  %105 = vst.msk [vmem:[#allocation2 + $0x11] sm:$0xff] %vm102_vm2, %v88_v9  ;;  %1355 = vmatmul.msk.f32.gmra.mxu0 %vm102_vm2, %v114_v10  ;;  %v1741_v10 = vld [vmem:[%s2164_s3 + $0x98] sm:$0xff] }
  0xb8   :  { %v219_v12 = vld [vmem:[#allocation2 + $0x2] sm:$0xff]  ;;  %1361 = vmatmul.msk.f32.gmra.mxu1 %vm102_vm2, %v109_v11  ;;  %v1746_v11 = vld [vmem:[%s2164_s3 + $0x90] sm:$0xff] }
  0xb9   :  { %1366 = vmatmul.msk.f32.vlgmr.msra.gmra.mxu2 %vm102_vm2, %v219_v12 }
  0xba   :  { %1399 = vmatpush.msk.msra.mxu2 %vm133_vm1, %v1583_v3  ;;  %v1753_v3 = vld [vmem:[%s2164_s3 + $0x88] sm:$0xff] }
  0xbe   :  { %v89_v13 = vpop.trf.xlu0  ;;  %v115_v14 = vld [vmem:[#allocation2 + $0x11] sm:$0xff] }
  0xbf   :  { %v110_v15 = vld [vmem:[#allocation2 + $0x10] sm:$0xff]  ;;  %106 = vst.msk [vmem:[#allocation2 + $0x19] sm:$0xff] %vm102_vm2, %v89_v13  ;;  %1356 = vmatmul.msk.f32.gmra.mxu0 %vm102_vm2, %v115_v14  ;;  %v1759_v14 = vld [vmem:[%s2164_s3 + $0x80] sm:$0xff] }
  0xc0   :  { %v220_v16 = vld [vmem:[#allocation2 + $0xa] sm:$0xff]  ;;  %1362 = vmatmul.msk.f32.gmra.mxu1 %vm102_vm2, %v110_v15 }
  0xc1   :  { %1367 = vmatmul.msk.f32.gmra.mxu2 %vm102_vm2, %v220_v16 }
  0xc6   :  { %v90_v17 = vpop.trf.xlu0  ;;  %v116_v18 = vld [vmem:[#allocation2 + $0x19] sm:$0xff] }
  0xc7   :  { %v111_v19 = vld [vmem:[#allocation2 + $0x18] sm:$0xff]  ;;  %107 = vst.msk [vmem:[#allocation2 + $0x21] sm:$0xff] %vm102_vm2, %v90_v17  ;;  %1357 = vmatmul.msk.f32.gmra.mxu0 %vm102_vm2, %v116_v18 }
  0xc8   :  { %v221_v20 = vld [vmem:[#allocation2 + $0x12] sm:$0xff]  ;;  %1363 = vmatmul.msk.f32.gmra.mxu1 %vm102_vm2, %v111_v19 }
  0xc9   :  { %1368 = vmatmul.msk.f32.gmra.mxu2 %vm102_vm2, %v221_v20 }
  0xce   :  { %v117_v21 = vld [vmem:[#allocation2 + $0x21] sm:$0xff] }
  0xcf   :  { %v112_v22 = vld [vmem:[#allocation2 + $0x20] sm:$0xff]  ;;  %1358 = vmatmul.msk.f32.gmra.mxu0 %vm102_vm2, %v117_v21 }
  0xd0   :  { %v222_v23 = vld [vmem:[#allocation2 + $0x1a] sm:$0xff]  ;;  %1364 = vmatmul.msk.f32.gmra.mxu1 %vm102_vm2, %v112_v22  ;;  %v223_v24 = vld [vmem:[#allocation2 + $0x22] sm:$0xff] }
  0xd1   :  { %1369 = vmatmul.msk.f32.gmra.mxu2 %vm102_vm2, %v222_v23 }
  0xd9   :  { %1370 = vmatmul.msk.f32.gmra.mxu2 %vm102_vm2, %v223_v24 }
 0x12c   :  { %v154_v25 = vpop.f32.mrf.mxu0 }
 0x12d   :  { %v204_v26 = vpop.f32.mrf.mxu1 }
 0x12e   :  { %v205_v47 = vadd.f32 %v204_v26, %v154_v25 }
 0x134   :  { %v157_v27 = vpop.f32.mrf.mxu0 }
 0x135   :  { %v207_v28 = vpop.f32.mrf.mxu1 }
 0x136   :  { %v208_v45 = vadd.f32 %v207_v28, %v157_v27 }
 0x13c   :  { %v259_v29 = vpop.f32.mrf.mxu2  ;;  %v160_v30 = vpop.f32.mrf.mxu0 }
 0x13d   :  { %v210_v31 = vpop.f32.mrf.mxu1  ;;  %v274_v49 = vadd.f32 %v259_v29, %v205_v47 }
 0x13e   :  { %v211_v43 = vadd.f32 %v210_v31, %v160_v30 }
 0x144   :  { %v262_v32 = vpop.f32.mrf.mxu2  ;;  %v163_v34 = vpop.f32.mrf.mxu0 }
 0x145   :  { %v213_v35 = vpop.f32.mrf.mxu1  ;;  %v275_v48 = vadd.f32 %v262_v32, %v208_v45 }
 0x146   :  { %v214_v41 = vadd.f32 %v213_v35, %v163_v34 }
 0x14c   :  { %v265_v33 = vpop.f32.mrf.mxu2  ;;  %v166_v37 = vpop.f32.mrf.mxu0 }
 0x14d   :  { %v216_v38 = vpop.f32.mrf.mxu1  ;;  %v276_v46 = vadd.f32 %v265_v33, %v211_v43 }
 0x14e   :  { %v217_v39 = vadd.f32 %v216_v38, %v166_v37 }
 0x154   :  { %v268_v36 = vpop.f32.mrf.mxu2 }
 0x155   :  { %v277_v44 = vadd.f32 %v268_v36, %v214_v41 }
 0x156   :  { %v640_v41 = vpop.trf.xlu0 }
 0x157   :  { %656 = vst.msk [vmem:[#allocation2 + $0x1] sm:$0xff] %vm102_vm2, %v640_v41 }
 0x15c   :  { %v271_v40 = vpop.f32.mrf.mxu2 }
 0x15d   :  { %v278_v42 = vadd.f32 %v271_v40, %v217_v39 }
 0x15e   :  { %v661_v47 = vld [vmem:[#allocation2] sm:$0xff] }
 0x15f   :  { %303 = vmatpush.msra.mxu3 %v278_v42 }
 0x161   :  { %304 = vmatpush.msra.mxu3 %v277_v44 }
 0x163   :  { %305 = vmatpush.msra.mxu3 %v276_v46  ;;  %v641_v46 = vpop.trf.xlu0 }
 0x164   :  { %657 = vst.msk [vmem:[#allocation2 + $0x9] sm:$0xff] %vm102_vm2, %v641_v46 }
 0x165   :  { %306 = vmatpush.msra.mxu3 %v275_v48  ;;  %v666_v48 = vld [vmem:[#allocation2 + $0x1] sm:$0xff] }
 0x167   :  { %307 = vmatpush.msra.mxu3 %v274_v49 }
 0x168   :  { %1371 = vmatmul.msk.f32.vlgmr.msra.gmra.mxu3 %vm282_vm3, %v1619_v50 }
 0x169   :  { %356 = vmatpush.msrb.mxu3 %v1640_v53 }
 0x16b   :  { %357 = vmatpush.msrb.mxu3 %v48_v56 }
 0x16d   :  { %358 = vmatpush.msrb.mxu3 %v47_v59 }
 0x16f   :  { %359 = vmatpush.msrb.mxu3 %v46_v62 }
 0x170   :  { %1372 = vmatmul.msk.f32.gmra.mxu3 %vm282_vm3, %v1626_v51 }
 0x171   :  { %511 = vmatpush.msra.mxu3 %v1741_v10 }
 0x173   :  { %512 = vmatpush.msra.mxu3 %v1746_v11 }
 0x175   :  { %513 = vmatpush.msra.mxu3 %v1753_v3 }
 0x177   :  { %514 = vmatpush.msra.mxu3 %v1759_v14 }
 0x178   :  { %1373 = vmatmul.msk.f32.gmra.mxu3 %vm282_vm3, %v1633_v52 }
 0x1eb   :  { %v309_v9 = vpop.f32.mrf.mxu3 }
 0x1ec   :  { %v310_v12 = vadd.f32 %v1736_v8, %v309_v9 }
 0x1ee   :  { %v318_v13 = vmax.f32 %v310_v12, 0.0 }
 0x1f0   :  { %v321_v15 = vmin.f32 %v318_v13, 6.0 }
 0x1f2   :  { %325 = vst.msk [vmem:[#allocation3 + $0x2] sm:$0xff] %vm324_vm5, %v321_v15 }
 0x1f3   :  { %v312_v16 = vpop.f32.mrf.mxu3 }
 0x1f4   :  { %v313_v17 = vadd.f32 %v1736_v8, %v312_v16 }
 0x1f6   :  { %v319_v18 = vmax.f32 %v313_v17, 0.0 }
 0x1f8   :  { %v322_v19 = vmin.f32 %v319_v18, 6.0 }
 0x1f9   :  { %v332_v20 = vld [vmem:[#allocation3 + $0x1] sm:$0xff] }
 0x1fa   :  { %v329_v21 = vld [vmem:[#allocation3] sm:$0xff]  ;;  %326 = vst.msk [vmem:[#allocation3 + $0xa] sm:$0xff] %vm324_vm5, %v322_v19  ;;  %1374 = vmatmul.msk.f32.vlgmr.msrb.gmra.mxu3 %vm324_vm5, %v332_v20 }
 0x1fb   :  { %v405_v22 = vld [vmem:[#allocation3 + $0x2] sm:$0xff]  ;;  %1377 = vmatmul.msk.f32.vlgmr.msrb.gmra.mxu0 %vm324_vm5, %v329_v21  ;;  %v315_v23 = vpop.f32.mrf.mxu3 }
 0x1fc   :  { %1380 = vmatmul.msk.f32.vlgmr.msrb.gmra.mxu1 %vm324_vm5, %v405_v22  ;;  %v316_v24 = vadd.f32 %v1736_v8, %v315_v23 }
 0x1fd   :  { %884 = vmatpush.msrb.mxu1 %v1640_v53 }
 0x1fe   :  { %v320_v25 = vmax.f32 %v316_v24, 0.0 }
 0x1ff   :  { %885 = vmatpush.msrb.mxu1 %v48_v56  ;;  %v662_v56 = vld [vmem:[#allocation2 + $0x8] sm:$0xff] }
 0x200   :  { %v323_v26 = vmin.f32 %v320_v25, 6.0 }
 0x201   :  { %886 = vmatpush.msrb.mxu1 %v47_v59  ;;  %v333_v27 = vld [vmem:[#allocation3 + $0x9] sm:$0xff] }
 0x202   :  { %v330_v28 = vld [vmem:[#allocation3 + $0x8] sm:$0xff]  ;;  %328 = vst.msk [vmem:[#allocation3 + $0x12] sm:$0xf] %vm327_vm6, %v323_v26  ;;  %1375 = vmatmul.msk.f32.gmra.mxu3 %vm324_vm5, %v333_v27 }
 0x203   :  { %v406_v29 = vld [vmem:[#allocation3 + $0xa] sm:$0xff]  ;;  %1378 = vmatmul.msk.f32.gmra.mxu0 %vm324_vm5, %v330_v28  ;;  %887 = vmatpush.msrb.mxu1 %v46_v62 }
 0x204   :  { %v446_v30 = vld [vmem:[#allocation3 + $0x3] sm:$0xff]  ;;  %1381 = vmatmul.msk.f32.gmra.mxu1 %vm324_vm5, %v406_v29  ;;  %v1809_v28 = vld [vmem:[%s2167_s6] sm:$0xff] }
 0x205   :  { %1383 = vmatmul.msk.f32.vlgmr.msrb.gmra.mxu2 %vm324_vm5, %v446_v30  ;;  %v487_v35 = vld [vmem:[#allocation3 + $0x4] sm:$0xff] }
 0x206   :  { %919 = vmatpush.msrb.mxu2 %v1645_v54  ;;  %v642_v54 = vpop.trf.xlu0 }
 0x207   :  { %658 = vst.msk [vmem:[#allocation2 + $0x11] sm:$0xff] %vm102_vm2, %v642_v54 }
 0x208   :  { %920 = vmatpush.msrb.mxu2 %v1663_v57  ;;  %v667_v57 = vld [vmem:[#allocation2 + $0x9] sm:$0xff] }
 0x209   :  { %v334_v31 = vld [vmem:[#allocation3 + $0x11] sm:$0xf] }
 0x20a   :  { %921 = vmatpush.msrb.mxu2 %v1678_v60  ;;  %v331_v32 = vld [vmem:[#allocation3 + $0x10] sm:$0xf]  ;;  %1376 = vmatmul.msk.f32.gmra.mxu3 %vm324_vm5, %v334_v31  ;;  %v489_v38 = vld [vmem:[#allocation3 + $0x14] sm:$0xf]  ;;  %v1822_v31 = vld [vmem:[%s2167_s6 + $0x8] sm:$0x3] }
 0x20b   :  { %v407_v33 = vld [vmem:[#allocation3 + $0x12] sm:$0xf]  ;;  %1379 = vmatmul.msk.f32.gmra.mxu0 %vm324_vm5, %v331_v32 }
 0x20c   :  { %v447_v34 = vld [vmem:[#allocation3 + $0xb] sm:$0xff]  ;;  %1382 = vmatmul.msk.f32.gmra.mxu1 %vm324_vm5, %v407_v33  ;;  %922 = vmatpush.msrb.mxu2 %v1693_v63  ;;  %v448_v36 = vld [vmem:[#allocation3 + $0x13] sm:$0xf] }
 0x20d   :  { %1384 = vmatmul.msk.f32.gmra.mxu2 %vm324_vm5, %v447_v34  ;;  %v488_v37 = vld [vmem:[#allocation3 + $0xc] sm:$0xff] }
 0x20e   :  { %v643_v2 = vpop.trf.xlu0  ;;  %v663_v9 = vld [vmem:[#allocation2 + $0x10] sm:$0xff] }
 0x20f   :  { %659 = vst.msk [vmem:[#allocation2 + $0x19] sm:$0xff] %vm102_vm2, %v643_v2  ;;  %v766_v32 = vld [vmem:[#allocation2 + $0xa] sm:$0xff] }
 0x212   :  { %1386 = vmatmul.msk.f32.vlgmr.msra.gmra.mxu3 %vm324_vm5, %v487_v35 }
 0x214   :  { %1394 = vmatmul.msk.f32.vlgmr.msra.gmra.mxu1 %vm102_vm2, %v666_v48 }
 0x215   :  { %1385 = vmatmul.msk.f32.gmra.mxu2 %vm324_vm5, %v448_v36  ;;  %1039 = vmatpush.msra.mxu1 %v1741_v10  ;;  %v668_v10 = vld [vmem:[#allocation2 + $0x11] sm:$0xff] }
 0x216   :  { %v644_v19 = vpop.trf.xlu0  ;;  %v664_v20 = vld [vmem:[#allocation2 + $0x18] sm:$0xff] }
 0x217   :  { %1040 = vmatpush.msra.mxu1 %v1746_v11  ;;  %v669_v21 = vld [vmem:[#allocation2 + $0x19] sm:$0xff]  ;;  %660 = vst.msk [vmem:[#allocation2 + $0x21] sm:$0xff] %vm102_vm2, %v644_v19 }
 0x219   :  { %1041 = vmatpush.msra.mxu1 %v1753_v3 }
 0x21a   :  { %1387 = vmatmul.msk.f32.gmra.mxu3 %vm324_vm5, %v488_v37 }
 0x21b   :  { %1042 = vmatpush.msra.mxu1 %v1759_v14 }
 0x21c   :  { %1395 = vmatmul.msk.f32.gmra.mxu1 %vm102_vm2, %v667_v57 }
 0x21d   :  { %1400 = vmatmul.msk.f32.vlgmr.msra.gmra.mxu2 %vm102_vm2, %v661_v47 }
 0x21e   :  { %v665_v29 = vld [vmem:[#allocation2 + $0x20] sm:$0xff] }
 0x21f   :  { %v670_v30 = vld [vmem:[#allocation2 + $0x21] sm:$0xff] }
 0x220   :  { %v769_v33 = vld [vmem:[#allocation2 + $0x22] sm:$0xff] }
 0x222   :  { %1388 = vmatmul.msk.f32.gmra.mxu3 %vm324_vm5, %v489_v38 }
 0x224   :  { %1396 = vmatmul.msk.f32.gmra.mxu1 %vm102_vm2, %v668_v10 }
 0x225   :  { %1401 = vmatmul.msk.f32.gmra.mxu2 %vm102_vm2, %v662_v56 }
 0x22c   :  { %1397 = vmatmul.msk.f32.gmra.mxu1 %vm102_vm2, %v669_v21 }
 0x22d   :  { %1402 = vmatmul.msk.f32.gmra.mxu2 %vm102_vm2, %v663_v9 }
 0x234   :  { %1398 = vmatmul.msk.f32.gmra.mxu1 %vm102_vm2, %v670_v30 }
 0x235   :  { %1403 = vmatmul.msk.f32.gmra.mxu2 %vm102_vm2, %v664_v20 }
 0x23d   :  { %1404 = vmatmul.msk.f32.gmra.mxu2 %vm102_vm2, %v665_v29 }
 0x278   :  { %v396_v42 = vpop.f32.mrf.mxu0 }
 0x279   :  { %v434_v43 = vpop.f32.mrf.mxu1 }
 0x27d   :  { %v361_v39 = vpop.f32.mrf.mxu3 }
 0x27e   :  { %v397_v14 = vadd.f32 %v396_v42, %v361_v39 }
 0x280   :  { %v399_v49 = vpop.f32.mrf.mxu0  ;;  %v443_v22 = vadd.f32 %v434_v43, %v397_v14 }
 0x281   :  { %v437_v59 = vpop.f32.mrf.mxu1 }
 0x285   :  { %v364_v40 = vpop.f32.mrf.mxu3 }
 0x286   :  { %v400_v12 = vadd.f32 %v399_v49, %v364_v40 }
 0x288   :  { %v475_v44 = vpop.f32.mrf.mxu2  ;;  %v402_v62 = vpop.f32.mrf.mxu0  ;;  %v444_v16 = vadd.f32 %v437_v59, %v400_v12 }
 0x289   :  { %v440_v3 = vpop.f32.mrf.mxu1  ;;  %v484_v25 = vadd.f32 %v475_v44, %v443_v22 }
 0x28d   :  { %v367_v45 = vpop.f32.mrf.mxu3 }
 0x28e   :  { %v403_v11 = vadd.f32 %v402_v62, %v367_v45 }
 0x290   :  { %v478_v60 = vpop.f32.mrf.mxu2  ;;  %v445_v15 = vadd.f32 %v440_v3, %v403_v11 }
 0x291   :  { %v485_v23 = vadd.f32 %v478_v60, %v444_v16  ;;  %v703_v34 = vpop.f32.mrf.mxu1 }
 0x295   :  { %v516_v53 = vpop.f32.mrf.mxu3 }
 0x296   :  { %v525_v27 = vadd.f32 %v516_v53, %v484_v25 }
 0x298   :  { %v481_v13 = vpop.f32.mrf.mxu2 }
 0x299   :  { %v486_v17 = vadd.f32 %v481_v13, %v445_v15  ;;  %v706_v39 = vpop.f32.mrf.mxu1 }
 0x29d   :  { %v519_v63 = vpop.f32.mrf.mxu3 }
 0x29e   :  { %v526_v26 = vadd.f32 %v519_v63, %v485_v23 }
 0x2a0   :  { %v750_v35 = vpop.f32.mrf.mxu2 }
 0x2a1   :  { %v709_v42 = vpop.f32.mrf.mxu1  ;;  %v751_v9 = vadd.f32 %v750_v35, %v703_v34 }
 0x2a5   :  { %v522_v18 = vpop.f32.mrf.mxu3 }
 0x2a6   :  { %v527_v24 = vadd.f32 %v522_v18, %v486_v17 }
 0x2a8   :  { %1389 = vmatpush.msk.msra.mxu0 %vm538_vm7, %v527_v24  ;;  %v753_v40 = vpop.f32.mrf.mxu2 }
 0x2a9   :  { %v712_v46 = vpop.f32.mrf.mxu1  ;;  %v754_v63 = vadd.f32 %v753_v40, %v706_v39 }
 0x2aa   :  { %556 = vmatpush.msra.mxu0 %v526_v26 }
 0x2ac   :  { %557 = vmatpush.msra.mxu0 %v525_v27 }
 0x2ad   :  { %1390 = vmatmul.msk.f32.vlgmr.msra.gmra.mxu0 %vm531_vm8, %v1809_v28 }
 0x2ae   :  { %1405 = vmatpush.msk.msrb.mxu0 %vm133_vm1, %v1592_v4  ;;  %v765_v4 = vld [vmem:[#allocation2 + $0x2] sm:$0xff]  ;;  %vm616_vm1 = vcmask 121856  }
 0x2b0   :  { %998 = vmatpush.msra.mxu0 %v1705_v1  ;;  %v767_v1 = vld [vmem:[#allocation2 + $0x12] sm:$0xff]  ;;  %v756_v43 = vpop.f32.mrf.mxu2 }
 0x2b1   :  { %v715_v49 = vpop.f32.mrf.mxu1  ;;  %v757_v60 = vadd.f32 %v756_v43, %v709_v42 }
 0x2b2   :  { %999 = vmatpush.msra.mxu0 %v1713_v5  ;;  %v768_v5 = vld [vmem:[#allocation2 + $0x1a] sm:$0xff] }
 0x2b4   :  { %1000 = vmatpush.msra.mxu0 %v1719_v6 }
 0x2b5   :  { %1391 = vmatmul.msk.f32.gmra.mxu0 %vm531_vm8, %v1822_v31 }
 0x2b6   :  { %1001 = vmatpush.msra.mxu0 %v1728_v7  ;;  %v1838_v7 = vld [vmem:[%s2165_s4] ss:$0 sm:$0xff]  ;;  %s1511_s4 = smov 86  }
 0x2b8   :  { %v759_v47 = vpop.f32.mrf.mxu2 }
 0x2b9   :  { %v760_v57 = vadd.f32 %v759_v47, %v712_v46 }
 0x2bd   :  { %1406 = vmatmul.msk.f32.vlgmr.msrb.gmra.mxu0 %vm102_vm2, %v765_v4 }
 0x2c0   :  { %v762_v53 = vpop.f32.mrf.mxu2 }
 0x2c1   :  { %v763_v54 = vadd.f32 %v762_v53, %v715_v49 }
 0x2c5   :  { %1407 = vmatmul.msk.f32.gmra.mxu0 %vm102_vm2, %v766_v32 }
 0x2cd   :  { %1408 = vmatmul.msk.f32.gmra.mxu0 %vm102_vm2, %v767_v1 }
 0x2d5   :  { %1409 = vmatmul.msk.f32.gmra.mxu0 %vm102_vm2, %v768_v5 }
 0x2dd   :  { %1410 = vmatmul.msk.f32.gmra.mxu0 %vm102_vm2, %v769_v33  ;;  %vm618_vm2 = vcmask 588800  }
 0x32a   :  { %v1833_v6 = vpop.f32.mrf.mxu0 }
 0x332   :  { %v562_v36 = vpop.f32.mrf.mxu0 }
 0x333   :  { %v1841_v37 = vadd.f32 %v1838_v7, %v562_v36 }
 0x335   :  { %v566_v38 = vmax.f32 %v1841_v37, 0.0  ;;  %v1165_v37 = vld [vmem:[%s2168_s7 + $0x70] sm:$0xff] }
 0x337   :  { %597 = vrot.lane.b32.xlu1 %v566_v38, %s1510_s22 }
 0x33a   :  { %v802_v41 = vpop.f32.mrf.mxu0 }
 0x33b   :  { %v817_v11 = vadd.f32 %v802_v41, %v751_v9 }
 0x342   :  { %v805_v44 = vpop.f32.mrf.mxu0 }
 0x343   :  { %v818_v10 = vadd.f32 %v805_v44, %v754_v63 }
 0x34a   :  { %v808_v45 = vpop.f32.mrf.mxu0 }
 0x34b   :  { %v819_v2 = vadd.f32 %v808_v45, %v757_v60 }
 0x352   :  { %v811_v48 = vpop.f32.mrf.mxu0 }
 0x353   :  { %v820_v62 = vadd.f32 %v811_v48, %v760_v57 }
 0x35a   :  { %v814_v56 = vpop.f32.mrf.mxu0 }
 0x35b   :  { %v821_v59 = vadd.f32 %v814_v56, %v763_v54 }
 0x35d   :  { %833 = vmatpush.msrb.mxu3 %v821_v59 }
 0x35f   :  { %834 = vmatpush.msrb.mxu3 %v820_v62 }
 0x361   :  { %835 = vmatpush.msrb.mxu3 %v819_v2  ;;  %v560_v2 = vadd.f32 %v1838_v7, %v1833_v6 }
 0x363   :  { %836 = vmatpush.msrb.mxu3 %v818_v10  ;;  %v1885_v10 = vmax.f32 %v560_v2, 0.0  ;;  %v1157_v2 = vld [vmem:[%s2168_s7 + $0x30] sm:$0xff] }
 0x365   :  { %837 = vmatpush.msrb.mxu3 %v817_v11 }
 0x366   :  { %1411 = vmatmul.msk.f32.vlgmr.msrb.gmra.mxu3 %vm282_vm3, %v1619_v50 }
 0x367   :  { %957 = vmatpush.msra.mxu3 %v1650_v55 }
 0x369   :  { %958 = vmatpush.msra.mxu3 %v1668_v58 }
 0x36b   :  { %959 = vmatpush.msra.mxu3 %v1683_v61 }
 0x36d   :  { %960 = vmatpush.msra.mxu3 %v1698_v0 }
 0x36e   :  { %1412 = vmatmul.msk.f32.gmra.mxu3 %vm282_vm3, %v1626_v51 }
 0x376   :  { %1413 = vmatmul.msk.f32.gmra.mxu3 %vm282_vm3, %v1633_v52  ;;  %vm620_vm3 = vcmask 7168  }
 0x3e9   :  { %v839_v12 = vpop.f32.mrf.mxu3 }
 0x3ea   :  { %v840_v3 = vadd.f32 %v1736_v8, %v839_v12 }
 0x3ec   :  { %v848_v13 = vmax.f32 %v840_v3, 0.0  ;;  %v588_v3 = vrot.slane %v1885_v10, 6 }
 0x3ee   :  { %v851_v14 = vmin.f32 %v848_v13, 6.0 }
 0x3f0   :  { %854 = vst.msk [vmem:[#allocation3 + $0x2] sm:$0xff] %vm324_vm5, %v851_v14  ;;  %v568_v14 = vrot.slane %v1885_v10, 1 }
 0x3f1   :  { %v842_v50 = vpop.f32.mrf.mxu3 }
 0x3f2   :  { %v843_v55 = vadd.f32 %v1736_v8, %v842_v50 }
 0x3f4   :  { %v849_v58 = vmax.f32 %v843_v55, 0.0 }
 0x3f6   :  { %v852_v61 = vmin.f32 %v849_v58, 6.0  ;;  %v592_v58 = vrot.slane %v1885_v10, 7 }
 0x3f7   :  { %v860_v15 = vld [vmem:[#allocation3 + $0x1] sm:$0xff] }
 0x3f8   :  { %v857_v0 = vld [vmem:[#allocation3] sm:$0xff]  ;;  %855 = vst.msk [vmem:[#allocation3 + $0xa] sm:$0xff] %vm324_vm5, %v852_v61  ;;  %1414 = vmatmul.msk.f32.vlgmr.msrb.gmra.mxu1 %vm324_vm5, %v860_v15  ;;  %v572_v61 = vrot.slane %v1885_v10, 2 }
 0x3f9   :  { %v933_v16 = vld [vmem:[#allocation3 + $0x2] sm:$0xff]  ;;  %1417 = vmatmul.msk.f32.vlgmr.msrb.gmra.mxu2 %vm324_vm5, %v857_v0  ;;  %v845_v51 = vpop.f32.mrf.mxu3 }
 0x3fa   :  { %1420 = vmatmul.msk.f32.vlgmr.msra.gmra.mxu3 %vm324_vm5, %v933_v16  ;;  %v846_v52 = vadd.f32 %v1736_v8, %v845_v51 }
 0x3fc   :  { %v850_v17 = vmax.f32 %v846_v52, 0.0 }
 0x3fe   :  { %v853_v18 = vmin.f32 %v850_v17, 6.0 }
 0x3ff   :  { %v861_v19 = vld [vmem:[#allocation3 + $0x9] sm:$0xff] }
 0x400   :  { %v858_v20 = vld [vmem:[#allocation3 + $0x8] sm:$0xff]  ;;  %856 = vst.msk [vmem:[#allocation3 + $0x12] sm:$0xf] %vm327_vm6, %v853_v18  ;;  %1415 = vmatmul.msk.f32.gmra.mxu1 %vm324_vm5, %v861_v19  ;;  %v576_v18 = vrot.slane %v1885_v10, 3 }
 0x401   :  { %v934_v21 = vld [vmem:[#allocation3 + $0xa] sm:$0xff]  ;;  %1418 = vmatmul.msk.f32.gmra.mxu2 %vm324_vm5, %v858_v20 }
 0x402   :  { %v974_v22 = vld [vmem:[#allocation3 + $0x3] sm:$0xff]  ;;  %1421 = vmatmul.msk.f32.gmra.mxu3 %vm324_vm5, %v934_v21  ;;  %v580_v21 = vrot.slane %v1885_v10, 4 }
 0x403   :  { %1423 = vmatmul.msk.f32.vlgmr.msra.gmra.mxu0 %vm324_vm5, %v974_v22  ;;  %v1015_v26 = vld [vmem:[#allocation3 + $0x4] sm:$0xff] }
 0x407   :  { %v862_v23 = vld [vmem:[#allocation3 + $0x11] sm:$0xf] }
 0x408   :  { %v859_v24 = vld [vmem:[#allocation3 + $0x10] sm:$0xf]  ;;  %1416 = vmatmul.msk.f32.gmra.mxu1 %vm324_vm5, %v862_v23  ;;  %v1017_v30 = vld [vmem:[#allocation3 + $0x14] sm:$0xf] }
 0x409   :  { %v935_v25 = vld [vmem:[#allocation3 + $0x12] sm:$0xf]  ;;  %1419 = vmatmul.msk.f32.gmra.mxu2 %vm324_vm5, %v859_v24  ;;  %v584_v24 = vrot.slane %v1885_v10, 5 }
 0x40a   :  { %v975_v8 = vld [vmem:[#allocation3 + $0xb] sm:$0xff]  ;;  %1422 = vmatmul.msk.f32.gmra.mxu3 %vm324_vm5, %v935_v25  ;;  %v976_v27 = vld [vmem:[#allocation3 + $0x13] sm:$0xf]  ;;  %v600_v25 = vrot.slane %v566_v38, 1  ;;  %v1181_v38 = vld [vmem:[%s2168_s7 + $0xf0] sm:$0xff] }
 0x40b   :  { %1424 = vmatmul.msk.f32.gmra.mxu0 %vm324_vm5, %v975_v8  ;;  %v1016_v29 = vld [vmem:[#allocation3 + $0xc] sm:$0xff] }
 0x410   :  { %1426 = vmatmul.msk.f32.vlgmr.msra.gmra.mxu1 %vm324_vm5, %v1015_v26  ;;  %v1166_v26 = vld [vmem:[%s2168_s7 + $0x78] sm:$0xff] }
 0x411   :  { %1235 = vmatpush.msrb.mxu3 %v1166_v26 }
 0x413   :  { %1425 = vmatmul.msk.f32.gmra.mxu0 %vm324_vm5, %v976_v27  ;;  %v1182_v27 = vld [vmem:[%s2168_s7 + $0xf8] sm:$0xff]  ;;  %1236 = vmatpush.msrb.mxu3 %v1165_v37 }
 0x414   :  { %1255 = vmatpush.msrb.mxu0 %v1182_v27  ;;  %v1201_v27 = vld [vmem:[%s2168_s7 + $0x190] sm:$0xff]  ;;  %v1222_v37 = vld [vmem:[%s2168_s7 + $0x238] sm:$0x3] }
 0x416   :  { %1256 = vmatpush.msrb.mxu0 %v1181_v38  ;;  %v1199_v38 = vld [vmem:[%s2168_s7 + $0x180] sm:$0xff] }
 0x418   :  { %1427 = vmatmul.msk.f32.gmra.mxu1 %vm324_vm5, %v1016_v29  ;;  %v1198_v29 = vld [vmem:[%s2168_s7 + $0x178] sm:$0xff] }
 0x419   :  { %1275 = vmatpush.msrb.mxu1 %v1198_v29  ;;  %v1200_v29 = vld [vmem:[%s2168_s7 + $0x188] sm:$0xff] }
 0x420   :  { %1428 = vmatmul.msk.f32.gmra.mxu1 %vm324_vm5, %v1017_v30  ;;  %v1197_v30 = vld [vmem:[%s2168_s7 + $0x170] sm:$0xff]  ;;  %vm1335_vm5 = vcmask 17408  }
 0x421   :  { %1276 = vmatpush.msrb.mxu1 %v1197_v30  ;;  %v1221_v30 = vld [vmem:[%s2168_s7 + $0x230] sm:$0xff] }
 0x475   :  { %v889_v4 = vpop.f32.mrf.mxu1 }
 0x47c   :  { %v924_v32 = vpop.f32.mrf.mxu2 }
 0x47d   :  { %v892_v1 = vpop.f32.mrf.mxu1  ;;  %v962_v5 = vpop.f32.mrf.mxu3  ;;  %v925_v46 = vadd.f32 %v924_v32, %v889_v4  ;;  %v1164_v4 = vld [vmem:[%s2168_s7 + $0x68] sm:$0xff] }
 0x47e   :  { %v1180_v32 = vld [vmem:[%s2168_s7 + $0xe8] sm:$0xff]  ;;  %1237 = vmatpush.msrb.mxu3 %v1164_v4 }
 0x47f   :  { %v971_v53 = vadd.f32 %v962_v5, %v925_v46  ;;  %v1163_v5 = vld [vmem:[%s2168_s7 + $0x60] sm:$0xff]  ;;  %1257 = vmatpush.msrb.mxu0 %v1180_v32  ;;  %v1160_v46 = vld [vmem:[%s2168_s7 + $0x48] sm:$0xff]  ;;  %v2113_v32 = vpop.permute.xlu1 %597 }
 0x480   :  { %v1003_v34 = vpop.f32.mrf.mxu0  ;;  %1238 = vmatpush.msrb.mxu3 %v1163_v5  ;;  %v1220_v4 = vld [vmem:[%s2168_s7 + $0x228] sm:$0xff]  ;;  %v1219_v5 = vld [vmem:[%s2168_s7 + $0x220] sm:$0xff] }
 0x481   :  { %v1012_v60 = vadd.f32 %v1003_v34, %v971_v53  ;;  %v1179_v34 = vld [vmem:[%s2168_s7 + $0xe0] sm:$0xff] }
 0x482   :  { %1258 = vmatpush.msrb.mxu0 %v1179_v34  ;;  %v1159_v53 = vld [vmem:[%s2168_s7 + $0x40] sm:$0xff]  ;;  %v1217_v34 = vld [vmem:[%s2168_s7 + $0x210] sm:$0xff] }
 0x484   :  { %v927_v35 = vpop.f32.mrf.mxu2 }
 0x485   :  { %v895_v33 = vpop.f32.mrf.mxu1  ;;  %v965_v36 = vpop.f32.mrf.mxu3  ;;  %v928_v44 = vadd.f32 %v927_v35, %v892_v1  ;;  %v1196_v1 = vld [vmem:[%s2168_s7 + $0x168] sm:$0xff]  ;;  %v1195_v35 = vld [vmem:[%s2168_s7 + $0x160] sm:$0xff] }
 0x486   :  { %1277 = vmatpush.msrb.mxu1 %v1196_v1 }
 0x487   :  { %v972_v48 = vadd.f32 %v965_v36, %v928_v44  ;;  %v1213_v36 = vld [vmem:[%s2168_s7 + $0x1f0] sm:$0xff] }
 0x488   :  { %v1006_v40 = vpop.f32.mrf.mxu0  ;;  %1278 = vmatpush.msrb.mxu1 %v1195_v35  ;;  %v1177_v44 = vld [vmem:[%s2168_s7 + $0xd0] sm:$0xff]  ;;  %v1216_v35 = vld [vmem:[%s2168_s7 + $0x208] sm:$0xff] }
 0x489   :  { %v1013_v57 = vadd.f32 %v1006_v40, %v972_v48  ;;  %v1178_v40 = vld [vmem:[%s2168_s7 + $0xd8] sm:$0xff]  ;;  %v1176_v48 = vld [vmem:[%s2168_s7 + $0xc8] sm:$0xff] }
 0x48a   :  { %1259 = vmatpush.msrb.mxu0 %v1178_v40  ;;  %v1215_v40 = vld [vmem:[%s2168_s7 + $0x200] sm:$0xff] }
 0x48c   :  { %v930_v41 = vpop.f32.mrf.mxu2  ;;  %1260 = vmatpush.msrb.mxu0 %v1177_v44 }
 0x48d   :  { %v1044_v39 = vpop.f32.mrf.mxu1  ;;  %v931_v42 = vadd.f32 %v930_v41, %v895_v33  ;;  %v968_v45 = vpop.f32.mrf.mxu3  ;;  %v1214_v33 = vld [vmem:[%s2168_s7 + $0x1f8] sm:$0xff] }
 0x48e   :  { %v1053_v63 = vadd.f32 %v1044_v39, %v1012_v60  ;;  %v1162_v39 = vld [vmem:[%s2168_s7 + $0x58] sm:$0xff]  ;;  %1261 = vmatpush.msrb.mxu0 %v1176_v48  ;;  %v1209_v60 = vld [vmem:[%s2168_s7 + $0x1d0] sm:$0xff] }
 0x48f   :  { %v973_v47 = vadd.f32 %v968_v45, %v931_v42  ;;  %v1194_v41 = vld [vmem:[%s2168_s7 + $0x158] sm:$0xff]  ;;  %v1161_v42 = vld [vmem:[%s2168_s7 + $0x50] sm:$0xff]  ;;  %1239 = vmatpush.msrb.mxu3 %v1162_v39 }
 0x490   :  { %v1009_v49 = vpop.f32.mrf.mxu0  ;;  %v1193_v45 = vld [vmem:[%s2168_s7 + $0x150] sm:$0xff]  ;;  %1279 = vmatpush.msrb.mxu1 %v1194_v41 }
 0x491   :  { %v1014_v54 = vadd.f32 %v1009_v49, %v973_v47  ;;  %v1211_v47 = vld [vmem:[%s2168_s7 + $0x1e0] sm:$0xff]  ;;  %1240 = vmatpush.msrb.mxu3 %v1161_v42  ;;  %v1192_v49 = vld [vmem:[%s2168_s7 + $0x148] sm:$0xff] }
 0x492   :  { %1280 = vmatpush.msrb.mxu1 %v1193_v45 }
 0x493   :  { %1241 = vmatpush.msrb.mxu3 %v1160_v46 }
 0x494   :  { %1281 = vmatpush.msrb.mxu1 %v1192_v49 }
 0x495   :  { %v1047_v43 = vpop.f32.mrf.mxu1  ;;  %1242 = vmatpush.msrb.mxu3 %v1159_v53 }
 0x496   :  { %v1054_v62 = vadd.f32 %v1047_v43, %v1013_v57  ;;  %v1212_v43 = vld [vmem:[%s2168_s7 + $0x1e8] sm:$0xff]  ;;  %v1191_v57 = vld [vmem:[%s2168_s7 + $0x140] sm:$0xff] }
 0x497   :  { %1282 = vmatpush.msrb.mxu1 %v1191_v57 }
 0x49d   :  { %v1050_v56 = vpop.f32.mrf.mxu1 }
 0x49e   :  { %v1055_v59 = vadd.f32 %v1050_v56, %v1014_v54  ;;  %v1210_v54 = vld [vmem:[%s2168_s7 + $0x1d8] sm:$0xff]  ;;  %v1175_v56 = vld [vmem:[%s2168_s7 + $0xc0] sm:$0xff] }
 0x49f   :  { %1262 = vmatpush.msrb.mxu0 %v1175_v56 }
 0x4a0   :  { %1429 = vmatpush.msk.msra.mxu2 %vm538_vm7, %v1055_v59  ;;  %v1158_v59 = vld [vmem:[%s2168_s7 + $0x38] sm:$0xff] }
 0x4a1   :  { %1243 = vmatpush.msrb.mxu3 %v1158_v59 }
 0x4a2   :  { %1073 = vmatpush.msra.mxu2 %v1054_v62  ;;  %v1174_v62 = vld [vmem:[%s2168_s7 + $0xb8] sm:$0xff] }
 0x4a3   :  { %1263 = vmatpush.msrb.mxu0 %v1174_v62  ;;  %1244 = vmatpush.msrb.mxu3 %v1157_v2 }
 0x4a4   :  { %1074 = vmatpush.msra.mxu2 %v1053_v63  ;;  %v1190_v63 = vld [vmem:[%s2168_s7 + $0x138] sm:$0xff] }
 0x4a5   :  { %1430 = vmatmul.msk.f32.vlgmr.msra.gmra.mxu2 %vm531_vm8, %v1809_v28  ;;  %1283 = vmatpush.msrb.mxu1 %v1190_v63 }
 0x4a6   :  { %1295 = vmatpush.msrb.mxu2 %v1214_v33  ;;  %v1218_v33 = vld [vmem:[%s2168_s7 + $0x218] sm:$0xff] }
 0x4a8   :  { %1296 = vmatpush.msrb.mxu2 %v1213_v36 }
 0x4aa   :  { %1297 = vmatpush.msrb.mxu2 %v1212_v43 }
 0x4ac   :  { %1298 = vmatpush.msrb.mxu2 %v1211_v47 }
 0x4ad   :  { %1431 = vmatmul.msk.f32.gmra.mxu2 %vm531_vm8, %v1822_v31 }
 0x4ae   :  { %1299 = vmatpush.msrb.mxu2 %v1210_v54 }
 0x4b0   :  { %1300 = vmatpush.msrb.mxu2 %v1209_v60 }
 0x528   :  { %v1076_v9 = vpop.f32.mrf.mxu2 }
 0x529   :  { %v1077_v11 = vadd.f32 %v1838_v7, %v1076_v9  ;;  %v1208_v9 = vld [vmem:[%s2168_s7 + $0x1c8] sm:$0xff] }
 0x52a   :  { %1301 = vmatpush.msrb.mxu2 %v1208_v9 }
 0x52b   :  { %v1888_v12 = vmax.f32 %v1077_v11, 0.0  ;;  %v1173_v11 = vld [vmem:[%s2168_s7 + $0xb0] sm:$0xff] }
 0x52c   :  { %1264 = vmatpush.msrb.mxu0 %v1173_v11 }
 0x52d   :  { %v1105_v13 = vrot.slane %v1888_v12, 6  ;;  %v1085_v28 = vrot.slane %v1888_v12, 1  ;;  %v1109_v6 = vrot.slane %v1888_v12, 7  ;;  %v1089_v55 = vrot.slane %v1888_v12, 2 }
 0x52e   :  { %v1093_v52 = vrot.slane %v1888_v12, 3  ;;  %v1097_v20 = vrot.slane %v1888_v12, 4 }
 0x52f   :  { %v1455_v50 = vpack.i.bf16 %v588_v3, %v1105_v13  ;;  %v1445_v31 = vpack.i.bf16 %v568_v14, %v1085_v28  ;;  %v1460_v0 = vpack.i.bf16 %v592_v58, %v1109_v6  ;;  %v1450_v16 = vpack.i.bf16 %v572_v61, %v1089_v55  ;;  %v1189_v3 = vld [vmem:[%s2168_s7 + $0x130] sm:$0xff]  ;;  %v1156_v13 = vld [vmem:[%s2168_s7 + $0x28] sm:$0xff]  ;;  %v1207_v14 = vld [vmem:[%s2168_s7 + $0x1c0] sm:$0xff] }
 0x530   :  { %v1079_v15 = vpop.f32.mrf.mxu2  ;;  %v1465_v19 = vpack.i.bf16 %v576_v18, %v1093_v52  ;;  %v1470_v23 = vpack.i.bf16 %v580_v21, %v1097_v20  ;;  %1284 = vmatpush.msrb.mxu1 %v1189_v3  ;;  %v1172_v28 = vld [vmem:[%s2168_s7 + $0xa8] sm:$0xff]  ;;  %1245 = vmatpush.msrb.mxu3 %v1156_v13  ;;  %v1206_v6 = vld [vmem:[%s2168_s7 + $0x1b8] sm:$0xff]  ;;  %v1171_v55 = vld [vmem:[%s2168_s7 + $0xa0] sm:$0xff] }
 0x531   :  { %1456 = vrot.lane.b32.xlu2 %v1455_v50, %s1511_s4  ;;  %1446 = vrot.lane.b32.xlu1 %v1445_v31, %s1512_s23  ;;  %v1080_v51 = vadd.f32 %v1838_v7, %v1079_v15  ;;  %v1101_v7 = vrot.slane %v1888_v12, 5  ;;  %v1188_v50 = vld [vmem:[%s2168_s7 + $0x128] sm:$0xff]  ;;  %v1155_v31 = vld [vmem:[%s2168_s7 + $0x20] sm:$0xff] }
 0x532   :  { %1302 = vmatpush.msrb.mxu2 %v1207_v14  ;;  %v1187_v58 = vld [vmem:[%s2168_s7 + $0x120] sm:$0xff]  ;;  %1265 = vmatpush.msrb.mxu0 %v1172_v28  ;;  %v1154_v61 = vld [vmem:[%s2168_s7 + $0x18] sm:$0xff]  ;;  %v1205_v15 = vld [vmem:[%s2168_s7 + $0x1b0] sm:$0xff] }
 0x533   :  { %v1083_v17 = vmax.f32 %v1080_v51, 0.0  ;;  %v1475_v8 = vpack.i.bf16 %v584_v24, %v1101_v7  ;;  %1285 = vmatpush.msrb.mxu1 %v1188_v50  ;;  %1246 = vmatpush.msrb.mxu3 %v1155_v31  ;;  %v1186_v51 = vld [vmem:[%s2168_s7 + $0x118] sm:$0xff]  ;;  %v1153_v52 = vld [vmem:[%s2168_s7 + $0x10] sm:$0xff]  ;;  %v1152_v20 = vld [vmem:[%s2168_s7 + $0x8] sm:$0xff] }
 0x534   :  { %1303 = vmatpush.msrb.mxu2 %v1206_v6  ;;  %1266 = vmatpush.msrb.mxu0 %v1171_v55  ;;  %v1169_v18 = vld [vmem:[%s2168_s7 + $0x90] sm:$0xff]  ;;  %v1203_v21 = vld [vmem:[%s2168_s7 + $0x1a0] sm:$0xff]  ;;  %v1202_v24 = vld [vmem:[%s2168_s7 + $0x198] sm:$0xff] }
 0x535   :  { %v1117_v22 = vrot.slane %v1083_v17, 1  ;;  %1286 = vmatpush.msrb.mxu1 %v1187_v58  ;;  %1247 = vmatpush.msrb.mxu3 %v1154_v61  ;;  %v1151_v7 = vld [vmem:[%s2168_s7] sm:$0xff] }
 0x536   :  { %1304 = vmatpush.msrb.mxu2 %v1205_v15 }
 0x537   :  { %1287 = vmatpush.msrb.mxu1 %v1186_v51  ;;  %1248 = vmatpush.msrb.mxu3 %v1153_v52 }
 0x539   :  { %1461 = vrot.lane.b32.xlu2 %v1460_v0, %s1513_s24  ;;  %1451 = vrot.lane.b32.xlu1 %v1450_v16, %s1514_s25  ;;  %v1170_v16 = vld [vmem:[%s2168_s7 + $0x98] sm:$0xff] }
 0x53a   :  { %1267 = vmatpush.msrb.mxu0 %v1170_v16  ;;  %1249 = vmatpush.msrb.mxu3 %v1152_v20 }
 0x53c   :  { %1268 = vmatpush.msrb.mxu0 %v1169_v18  ;;  %1250 = vmatpush.msrb.mxu3 %v1151_v7 }
 0x53e   :  { %1432 = vmatpush.msk.msra.mxu3 %vm1231_vm9, %v1222_v37 }
 0x540   :  { %1324 = vmatpush.msra.mxu3 %v1221_v30 }
 0x541   :  { %1466 = vrot.lane.b32.xlu2 %v1465_v19, %s1515_s26  ;;  %1114 = vrot.lane.b32.xlu1 %v1083_v17, %s1510_s22  ;;  %v1204_v17 = vld [vmem:[%s2168_s7 + $0x1a8] sm:$0xff]  ;;  %v1185_v19 = vld [vmem:[%s2168_s7 + $0x110] sm:$0xff] }
 0x542   :  { %1305 = vmatpush.msrb.mxu2 %v1204_v17  ;;  %1288 = vmatpush.msrb.mxu1 %v1185_v19 }
 0x543   :  { %1325 = vmatpush.msra.mxu3 %v1220_v4 }
 0x544   :  { %1306 = vmatpush.msrb.mxu2 %v1203_v21 }
 0x545   :  { %1326 = vmatpush.msra.mxu3 %v1219_v5 }
 0x546   :  { %1307 = vmatpush.msrb.mxu2 %v1202_v24 }
 0x547   :  { %1327 = vmatpush.msra.mxu3 %v1218_v33 }
 0x548   :  { %1308 = vmatpush.msrb.mxu2 %v1201_v27 }
 0x549   :  { %1471 = vrot.lane.b32.xlu2 %v1470_v23, %s1516_s27  ;;  %1118 = vrot.lane.b32.xlu1 %v1117_v22, %s1517_s5  ;;  %v1168_v22 = vld [vmem:[%s2168_s7 + $0x88] sm:$0xff] }
 0x54a   :  { %v1184_v23 = vld [vmem:[%s2168_s7 + $0x108] sm:$0xff]  ;;  %1269 = vmatpush.msrb.mxu0 %v1168_v22  ;;  %1309 = vmatpush.msrb.mxu2 %v1200_v29 }
 0x54b   :  { %1289 = vmatpush.msrb.mxu1 %v1184_v23  ;;  %1328 = vmatpush.msra.mxu3 %v1217_v34 }
 0x54c   :  { %1310 = vmatpush.msrb.mxu2 %v1199_v38 }
 0x54d   :  { %1329 = vmatpush.msra.mxu3 %v1216_v35 }
 0x54f   :  { %1330 = vmatpush.msra.mxu3 %v1215_v40 }
 0x551   :  { %1476 = vrot.lane.b32.xlu2 %v1475_v8, %s1518_s28  ;;  %601 = vrot.lane.b32.xlu1 %v600_v25, %s1517_s5  ;;  %v1167_v25 = vld [vmem:[%s2168_s7 + $0x80] sm:$0xff] }
 0x552   :  { %v1183_v8 = vld [vmem:[%s2168_s7 + $0x100] sm:$0xff]  ;;  %1270 = vmatpush.msrb.mxu0 %v1167_v25 }
 0x553   :  { %1290 = vmatpush.msrb.mxu1 %v1183_v8  ;;  %v1482_v8 = vld [vmem:[%s2169_s8] ss:$0 sm:$0xff] }
 0x58b   :  { %v2049_v0 = vpop.permute.xlu2 %1456 }
 0x58c   :  { %v1459_v41 = vunpack.i.h.bf16 %v2049_v0  ;;  %v1458_v42 = vunpack.i.l.bf16 %v2049_v0 }
 0x593   :  { %v2093_v26 = vpop.permute.xlu2 %1461 }
 0x594   :  { %v1464_v45 = vunpack.i.h.bf16 %v2093_v26  ;;  %v1463_v59 = vunpack.i.l.bf16 %v2093_v26 }
 0x596   :  { %v617_v0 = vsel %vm616_vm1, %v1459_v41, %v1464_v45  ;;  %v1127_v16 = vsel %vm616_vm1, %v1458_v42, %v1463_v59 }
 0x597   :  { %v619_v19 = vsel %vm618_vm2, %v617_v0, %v2113_v32 }
 0x59b   :  { %v1467_v1 = vpop.permute.xlu2 %1466 }
 0x59c   :  { %v1469_v60 = vunpack.i.h.bf16 %v1467_v1  ;;  %v1468_v62 = vunpack.i.l.bf16 %v1467_v1 }
 0x5a3   :  { %v1472_v36 = vpop.permute.xlu2 %1471  ;;  %v1447_v39 = vpop.permute.xlu1 %1446 }
 0x5a4   :  { %v1448_v43 = vunpack.i.l.bf16 %v1447_v39  ;;  %v1449_v44 = vunpack.i.h.bf16 %v1447_v39  ;;  %v1474_v46 = vunpack.i.h.bf16 %v1472_v36  ;;  %v1473_v47 = vunpack.i.l.bf16 %v1472_v36 }
 0x5a6   :  { %v1121_v63 = vsel %vm604_vm10, %v1888_v12, %v1448_v43  ;;  %v605_v2 = vsel %vm604_vm10, %v1885_v10, %v1449_v44 }
 0x5ab   :  { %v1477_v48 = vpop.permute.xlu2 %1476  ;;  %v1452_v49 = vpop.permute.xlu1 %1451 }
 0x5ac   :  { %v1479_v53 = vunpack.i.h.bf16 %v1477_v48  ;;  %v1478_v54 = vunpack.i.l.bf16 %v1477_v48  ;;  %v1454_v56 = vunpack.i.h.bf16 %v1452_v49  ;;  %v1453_v57 = vunpack.i.l.bf16 %v1452_v49 }
 0x5ae   :  { %v613_v9 = vsel %vm612_vm11, %v1474_v46, %v1479_v53  ;;  %v1125_v11 = vsel %vm612_vm11, %v1473_v47, %v1478_v54  ;;  %v1122_v3 = vsel %vm606_vm13, %v1121_v63, %v1453_v57  ;;  %v609_v14 = vsel %vm608_vm14, %v1454_v56, %v1469_v60 }
 0x5af   :  { %v1126_v13 = vsel %vm614_vm12, %v1125_v11, %v1458_v42  ;;  %v1123_v28 = vsel %vm608_vm14, %v1453_v57, %v1468_v62  ;;  %v1135_v50 = vrot.slane %v1122_v3, 7  ;;  %v607_v12 = vsel %vm606_vm13, %v605_v2, %v1454_v56 }
 0x5b0   :  { %v1137_v31 = vrot.slane %v1126_v13, 7  ;;  %v1124_v6 = vsel %vm610_vm0, %v1123_v28, %v1473_v47  ;;  %v615_v55 = vsel %vm614_vm12, %v613_v9, %v1459_v41  ;;  %v611_v15 = vsel %vm610_vm0, %v609_v14, %v1474_v46 }
 0x5b1   :  { %v1146_v10 = vsel %vm1145_vm15, %v607_v12, %v1135_v50  ;;  %v1136_v58 = vrot.slane %v1124_v6, 7 }
 0x5b2   :  { %1251 = vmatmul.f32.vlgmr.msrb.gmra.mxu3 %v1146_v10  ;;  %v1148_v61 = vsel %vm1145_vm15, %v615_v55, %v1137_v31 }
 0x5b3   :  { %1291 = vmatmul.f32.vlgmr.msrb.gmra.mxu1 %v1148_v61  ;;  %v1115_v51 = vpop.permute.xlu1 %1114  ;;  %v1147_v52 = vsel %vm1145_vm15, %v611_v15, %v1136_v58 }
 0x5b4   :  { %v1128_v17 = vsel %vm618_vm2, %v1127_v16, %v1115_v51  ;;  %1271 = vmatmul.f32.vlgmr.msrb.gmra.mxu0 %v1147_v52 }
 0x5b5   :  { %v1138_v18 = vrot.slane %v1128_v17, 7 }
 0x5b7   :  { %v1149_v20 = vsel %vm1145_vm15, %v619_v19, %v1138_v18 }
 0x5b8   :  { %1311 = vmatmul.f32.vlgmr.msrb.gmra.mxu2 %v1149_v20 }
 0x5bb   :  { %v1119_v21 = vpop.permute.xlu1 %1118 }
 0x5bc   :  { %v1129_v22 = vsel %vm620_vm3, %v1115_v51, %v1119_v21 }
 0x5bd   :  { %v1139_v23 = vrot.slane %v1129_v22, 7 }
 0x5c3   :  { %v602_v7 = vpop.permute.xlu1 %601 }
 0x5c4   :  { %v621_v24 = vsel %vm620_vm3, %v2113_v32, %v602_v7 }
 0x5c5   :  { %v1150_v25 = vsel %vm1145_vm15, %v621_v24, %v1139_v23 }
 0x5c6   :  { %1433 = vmatmul.msk.f32.vlgmr.msra.gmra.mxu3 %vm1227_vm4, %v1150_v25 }
 0x630   :  { %v1292_v38 = vpop.f32.mrf.mxu1 }
 0x631   :  { %v1272_v29 = vpop.f32.mrf.mxu0 }
 0x635   :  { %v1252_v26 = vpop.f32.mrf.mxu3 }
 0x636   :  { %v1253_v27 = vadd.f32 %v1482_v8, %v1252_v26 }
 0x638   :  { %v1273_v37 = vadd.f32 %v1272_v29, %v1253_v27 }
 0x63a   :  { %v1293_v30 = vadd.f32 %v1292_v38, %v1273_v37 }
 0x63b   :  { %v1312_v4 = vpop.f32.mrf.mxu2 }
 0x63c   :  { %v1313_v32 = vadd.f32 %v1312_v4, %v1293_v30 }
 0x649   :  { %v1332_v1 = vpop.f32.mrf.mxu3 }
 0x64a   :  { %v1333_v5 = vadd.f32 %v1332_v1, %v1313_v32 }
 0x64c   :  { %1336 = vst.msk [vmem:[#allocation4] sm:$0x3] %vm1335_vm5, %v1333_v5 }
 0x64d   :  { %1347 = dma.vmem_to_hbm [thread:$0]  %s1343_s14, 32, %s1345_s16, [#allocation5]  }
 0x64e   :  { %1507 = dma.done.wait [#allocation5], 32  }
 0x64f   :  { %1508 = vsyncadd [#allocation5], 4294967264 }
 0x650   :  { %1352 = vsyncpa [#allocation5], 1 }

</bundles_post_ra>
